<compile_context>
chip_gen: v6e
topology: v6e:2x2x1
jax: 0.10.0
libtpu: 0.0.40
codegen_flags: <defaults>
</compile_context>

<pallas_src>
import functools

import jax
import jax.numpy as jnp
from jax.experimental import pallas as pl
from jax.experimental.pallas import tpu as pltpu


# ---------------------------------------------------------------------------
# Kernel
# ---------------------------------------------------------------------------
def vae_kernel(x_ref, eps_ref,
               w1_ref, b1_ref,
               wh_ref, bh_ref,        # fused fc21|fc22 head: (400, 2*LZ)
               w3_ref, b3_ref,
               w4_ref, b4_ref,
               recon_ref, ml_ref):
    f32 = jnp.float32
    bf16 = jnp.bfloat16

    x = x_ref[...]                                   # (TB, 784) f32
    eps = eps_ref[...]                               # (TB, LZ)  f32
    lz = eps.shape[1]

    # ---- encode: fc1 + relu (bf16 MXU, f32 accumulate, f32 elementwise) ----
    h1 = jnp.dot(x.astype(bf16), w1_ref[...], preferred_element_type=f32)
    h1 = jnp.maximum(h1 + b1_ref[...].astype(f32), 0.0)          # (TB, 400)

    # ---- fused fc21/fc22 head: [:, :LZ] = mu, [:, LZ:] = logvar ----
    ml = jnp.dot(h1.astype(bf16), wh_ref[...], preferred_element_type=f32)
    ml = ml + bh_ref[...].astype(f32)                            # (TB, 2*LZ)
    mu = ml[:, :lz]
    logvar = ml[:, lz:]

    # ---- reparameterize: z = mu + eps * exp(0.5 * logvar) ----
    z = mu + eps * jnp.exp(0.5 * logvar)                         # (TB, LZ)

    # ---- decode: fc3 + relu, fc4 + sigmoid ----
    h3 = jnp.dot(z.astype(bf16), w3_ref[...], preferred_element_type=f32)
    h3 = jnp.maximum(h3 + b3_ref[...].astype(f32), 0.0)          # (TB, 400)
    logits = jnp.dot(h3.astype(bf16), w4_ref[...], preferred_element_type=f32)
    logits = logits + b4_ref[...].astype(f32)                    # (TB, 784)

    recon_ref[...] = jax.nn.sigmoid(logits)
    ml_ref[...] = ml


# ---------------------------------------------------------------------------
# Wrapper
# ---------------------------------------------------------------------------
def vae_forward(x, eps, params, *, block_b=None):
    """x: (B, 784) f32, eps: (B, LZ) f32, params: dict of bf16 (in,out) weights
    and (1,out) biases with the fc21/fc22 head fused as w_head/b_head.
    Returns (recon, mu, logvar) in f32."""
    B, d_in = x.shape
    lz = eps.shape[1]
    h = params["w1"].shape[1]

    # Batch tiling: weights stay resident across grid steps, activations stream.
    # Tile capped at 256 rows so activation blocks stay tiny vs v7x's 64 MiB VMEM.
    b8 = 8 * pl.cdiv(B, 8)
    tb = block_b if block_b is not None else min(b8, 256)
    tb = 8 * pl.cdiv(tb, 8)
    b_pad = tb * pl.cdiv(b8, tb)
    nb = b_pad // tb

    if b_pad != B:
        x = jnp.concatenate(
            [x, jnp.zeros((b_pad - B, d_in), x.dtype)], axis=0)
        eps = jnp.concatenate(
            [eps, jnp.zeros((b_pad - B, lz), eps.dtype)], axis=0)

    batch_spec = lambda cols: pl.BlockSpec((tb, cols), lambda i: (i, 0))
    resident = lambda shape: pl.BlockSpec(shape, lambda i: (0, 0))

    in_specs = [
        batch_spec(d_in),                 # x
        batch_spec(lz),                   # eps
        resident((d_in, h)),              # w1
        resident((1, h)),                 # b1
        resident((h, 2 * lz)),            # w_head (fc21|fc22)
        resident((1, 2 * lz)),            # b_head
        resident((lz, h)),                # w3
        resident((1, h)),                 # b3
        resident((h, d_in)),              # w4
        resident((1, d_in)),              # b4
    ]
    out_specs = (
        batch_spec(d_in),                 # recon
        batch_spec(2 * lz),               # [mu | logvar]
    )
    out_shape = (
        jax.ShapeDtypeStruct((b_pad, d_in), jnp.float32),
        jax.ShapeDtypeStruct((b_pad, 2 * lz), jnp.float32),
    )

    # Advisory cost estimate (kernel is weight-DMA bound at small B).
    w_elems = d_in * h + h * 2 * lz + lz * h + h * d_in
    b_elems = h + 2 * lz + h + d_in
    cost = pl.CostEstimate(
        flops=2 * b_pad * w_elems,
        transcendentals=b_pad * (lz + d_in),            # exp + sigmoid
        bytes_accessed=2 * (w_elems + b_elems)          # bf16 weights/biases
        + 4 * b_pad * (d_in + lz)                       # x, eps (f32 in)
        + 4 * b_pad * (d_in + 2 * lz),                  # recon, mu|logvar (f32 out)
    )

    recon_p, ml_p = pl.pallas_call(
        vae_kernel,
        out_shape=out_shape,
        grid=(nb,),
        in_specs=in_specs,
        out_specs=out_specs,
        compiler_params=pltpu.CompilerParams(
            dimension_semantics=("parallel",)),
        cost_estimate=cost,
    )(x, eps,
      params["w1"], params["b1"],
      params["w_head"], params["b_head"],
      params["w3"], params["b3"],
      params["w4"], params["b4"])

    recon = recon_p[:B]
    mu = ml_p[:B, :lz]
    logvar = ml_p[:B, lz:]
    return recon, mu, logvar


# ---------------------------------------------------------------------------
# Params (PyTorch nn.Linear-style init), stored in bf16 with fc21/fc22 fused
# ---------------------------------------------------------------------------
def init_params(key):
    def linear(key, fan_in, fan_out):
        kw, kb = jax.random.split(key)
        bound = 1.0 / jnp.sqrt(jnp.float32(fan_in))
        w = jax.random.uniform(kw, (fan_in, fan_out), jnp.float32, -bound, bound)
        b = jax.random.uniform(kb, (1, fan_out), jnp.float32, -bound, bound)
        return w, b

    keys = jax.random.split(key, 5)
    w1, b1 = linear(keys[0], 784, 400)
    w21, b21 = linear(keys[1], 400, 20)
    w22, b22 = linear(keys[2], 400, 20)
    w3, b3 = linear(keys[3], 20, 400)
    w4, b4 = linear(keys[4], 400, 784)

    bf16 = jnp.bfloat16
    return dict(
        w1=w1.astype(bf16), b1=b1.astype(bf16),
        w_head=jnp.concatenate([w21, w22], axis=1).astype(bf16),   # (400, 40)
        b_head=jnp.concatenate([b21, b22], axis=1).astype(bf16),   # (1, 40)
        w3=w3.astype(bf16), b3=b3.astype(bf16),
        w4=w4.astype(bf16), b4=b4.astype(bf16),
    )


# ---------------------------------------------------------------------------
# Pure-JAX reference (same bf16-weight / f32-accumulate math)
# ---------------------------------------------------------------------------
def vae_forward_ref(x, eps, p):
    f32, bf16 = jnp.float32, jnp.bfloat16

    def dense(a, w, b):
        return jnp.dot(a.astype(bf16), w, preferred_element_type=f32) + b.astype(f32)

    lz = eps.shape[1]
    h1 = jnp.maximum(dense(x, p["w1"], p["b1"]), 0.0)
    ml = dense(h1, p["w_head"], p["b_head"])
    mu, logvar = ml[:, :lz], ml[:, lz:]
    z = mu + eps * jnp.exp(0.5 * logvar)
    h3 = jnp.maximum(dense(z, p["w3"], p["b3"]), 0.0)
    recon = jax.nn.sigmoid(dense(h3, p["w4"], p["b4"]))
    return recon, mu, logvar


if __name__ == "__main__":
    key = jax.random.PRNGKey(0)
    k_params, k_x, k_eps = jax.random.split(key, 3)

    B = 8
    # MNIST-like NCHW input flattened to (B, 784), as in VAE.forward().
    x_img = jax.random.normal(k_x, (B, 1, 28, 28), jnp.float32)
    x = x_img.reshape(-1, 784)
    # eps for reparameterize (torch.randn_like(std)) — passed in explicitly.
    eps = jax.random.normal(k_eps, (B, 20), jnp.float32)

    params = init_params(k_params)

    recon, mu, logvar = vae_forward(x, eps, params)
    jax.block_until_ready((recon, mu, logvar))

    # sanity check against pure-JAX reference (same bf16-weight math)
    r_ref, mu_ref, lv_ref = vae_forward_ref(x, eps, params)
    assert recon.shape == (B, 784) and mu.shape == (B, 20) and logvar.shape == (B, 20)
    assert jnp.allclose(recon, r_ref, atol=2e-3, rtol=2e-3)
    assert jnp.allclose(mu, mu_ref, atol=2e-3, rtol=2e-3)
    assert jnp.allclose(logvar, lv_ref, atol=2e-3, rtol=2e-3)

    print("KERNEL_OK")
</pallas_src>

<mosaic_0001>
module attributes {stable_mosaic.version = 11 : i64} {
  func.func @vae_kernel(%arg0: i32, %arg1: memref<8x784xf32, #tpu.memory_space<vmem>>, %arg2: memref<8x20xf32, #tpu.memory_space<vmem>>, %arg3: memref<784x400xbf16, #tpu.memory_space<vmem>>, %arg4: memref<1x400xbf16, #tpu.memory_space<vmem>>, %arg5: memref<400x40xbf16, #tpu.memory_space<vmem>>, %arg6: memref<1x40xbf16, #tpu.memory_space<vmem>>, %arg7: memref<20x400xbf16, #tpu.memory_space<vmem>>, %arg8: memref<1x400xbf16, #tpu.memory_space<vmem>>, %arg9: memref<400x784xbf16, #tpu.memory_space<vmem>>, %arg10: memref<1x784xbf16, #tpu.memory_space<vmem>>, %arg11: memref<8x784xf32, #tpu.memory_space<vmem>>, %arg12: memref<8x40xf32, #tpu.memory_space<vmem>>) attributes {dimension_semantics = [#tpu.dimension_semantics<parallel>], iteration_bounds = array<i64: 1>, scalar_prefetch = 0 : i64, scratch_operands = 0 : i64, tpu.core_type = #tpu.core_type<tc>, window_params = [{transform_indices = @transform_0, window_bounds = array<i64: 8, 784>}, {transform_indices = @transform_1, window_bounds = array<i64: 8, 20>}, {pipeline_mode = #tpu.pipeline_mode<synchronous>, transform_indices = @transform_2, window_bounds = array<i64: 784, 400>}, {pipeline_mode = #tpu.pipeline_mode<synchronous>, transform_indices = @transform_3, window_bounds = array<i64: 1, 400>}, {pipeline_mode = #tpu.pipeline_mode<synchronous>, transform_indices = @transform_4, window_bounds = array<i64: 400, 40>}, {pipeline_mode = #tpu.pipeline_mode<synchronous>, transform_indices = @transform_5, window_bounds = array<i64: 1, 40>}, {pipeline_mode = #tpu.pipeline_mode<synchronous>, transform_indices = @transform_6, window_bounds = array<i64: 20, 400>}, {pipeline_mode = #tpu.pipeline_mode<synchronous>, transform_indices = @transform_7, window_bounds = array<i64: 1, 400>}, {pipeline_mode = #tpu.pipeline_mode<synchronous>, transform_indices = @transform_8, window_bounds = array<i64: 400, 784>}, {pipeline_mode = #tpu.pipeline_mode<synchronous>, transform_indices = @transform_9, window_bounds = array<i64: 1, 784>}, {transform_indices = @transform_10, window_bounds = array<i64: 8, 784>}, {transform_indices = @transform_11, window_bounds = array<i64: 8, 40>}]} {
    %c0 = arith.constant 0 : index
    %c0_0 = arith.constant 0 : index
    %0 = vector.load %arg1[%c0, %c0_0] : memref<8x784xf32, #tpu.memory_space<vmem>>, vector<8x784xf32>
    %c0_1 = arith.constant 0 : index
    %c0_2 = arith.constant 0 : index
    %1 = vector.load %arg2[%c0_1, %c0_2] : memref<8x20xf32, #tpu.memory_space<vmem>>, vector<8x20xf32>
    %2 = arith.truncf %0 : vector<8x784xf32> to vector<8x784xbf16>
    %c0_3 = arith.constant 0 : index
    %c0_4 = arith.constant 0 : index
    %3 = vector.load %arg3[%c0_3, %c0_4] : memref<784x400xbf16, #tpu.memory_space<vmem>>, vector<784x400xbf16>
    %cst = arith.constant dense<0.000000e+00> : vector<8x400xf32>
    %4 = tpu.matmul %2, %3, %cst {dimension_numbers = #tpu.dot_dimension_numbers<[1], [0], [0], [1], [0, 0, 1, 1], [], []>} : vector<8x784xbf16>, vector<784x400xbf16>, vector<8x400xf32> -> vector<8x400xf32>
    %c0_5 = arith.constant 0 : index
    %c0_6 = arith.constant 0 : index
    %5 = vector.load %arg4[%c0_5, %c0_6] : memref<1x400xbf16, #tpu.memory_space<vmem>>, vector<1x400xbf16>
    %6 = arith.extf %5 : vector<1x400xbf16> to vector<1x400xf32>
    %7 = vector.broadcast %6 : vector<1x400xf32> to vector<8x400xf32>
    %8 = arith.addf %4, %7 : vector<8x400xf32>
    %cst_7 = arith.constant 0.000000e+00 : f32
    %9 = vector.broadcast %cst_7 : f32 to vector<8x400xf32>
    %10 = arith.maximumf %8, %9 : vector<8x400xf32>
    %11 = arith.truncf %10 : vector<8x400xf32> to vector<8x400xbf16>
    %c0_8 = arith.constant 0 : index
    %c0_9 = arith.constant 0 : index
    %12 = vector.load %arg5[%c0_8, %c0_9] : memref<400x40xbf16, #tpu.memory_space<vmem>>, vector<400x40xbf16>
    %cst_10 = arith.constant dense<0.000000e+00> : vector<8x40xf32>
    %13 = tpu.matmul %11, %12, %cst_10 {dimension_numbers = #tpu.dot_dimension_numbers<[1], [0], [0], [1], [0, 0, 1, 1], [], []>} : vector<8x400xbf16>, vector<400x40xbf16>, vector<8x40xf32> -> vector<8x40xf32>
    %c0_11 = arith.constant 0 : index
    %c0_12 = arith.constant 0 : index
    %14 = vector.load %arg6[%c0_11, %c0_12] : memref<1x40xbf16, #tpu.memory_space<vmem>>, vector<1x40xbf16>
    %15 = arith.extf %14 : vector<1x40xbf16> to vector<1x40xf32>
    %16 = vector.broadcast %15 : vector<1x40xf32> to vector<8x40xf32>
    %17 = arith.addf %13, %16 : vector<8x40xf32>
    %18 = vector.extract_strided_slice %17 {offsets = [0, 0], sizes = [8, 20], strides = [1, 1]} : vector<8x40xf32> to vector<8x20xf32>
    %19 = vector.extract_strided_slice %17 {offsets = [0, 20], sizes = [8, 20], strides = [1, 1]} : vector<8x40xf32> to vector<8x20xf32>
    %cst_13 = arith.constant 5.000000e-01 : f32
    %20 = vector.broadcast %cst_13 : f32 to vector<8x20xf32>
    %21 = arith.mulf %20, %19 : vector<8x20xf32>
    %22 = math.exp %21 : vector<8x20xf32>
    %23 = arith.mulf %1, %22 : vector<8x20xf32>
    %24 = arith.addf %18, %23 : vector<8x20xf32>
    %25 = arith.truncf %24 : vector<8x20xf32> to vector<8x20xbf16>
    %c0_14 = arith.constant 0 : index
    %c0_15 = arith.constant 0 : index
    %26 = vector.load %arg7[%c0_14, %c0_15] : memref<20x400xbf16, #tpu.memory_space<vmem>>, vector<20x400xbf16>
    %cst_16 = arith.constant dense<0.000000e+00> : vector<8x400xf32>
    %27 = tpu.matmul %25, %26, %cst_16 {dimension_numbers = #tpu.dot_dimension_numbers<[1], [0], [0], [1], [0, 0, 1, 1], [], []>} : vector<8x20xbf16>, vector<20x400xbf16>, vector<8x400xf32> -> vector<8x400xf32>
    %c0_17 = arith.constant 0 : index
    %c0_18 = arith.constant 0 : index
    %28 = vector.load %arg8[%c0_17, %c0_18] : memref<1x400xbf16, #tpu.memory_space<vmem>>, vector<1x400xbf16>
    %29 = arith.extf %28 : vector<1x400xbf16> to vector<1x400xf32>
    %30 = vector.broadcast %29 : vector<1x400xf32> to vector<8x400xf32>
    %31 = arith.addf %27, %30 : vector<8x400xf32>
    %cst_19 = arith.constant 0.000000e+00 : f32
    %32 = vector.broadcast %cst_19 : f32 to vector<8x400xf32>
    %33 = arith.maximumf %31, %32 : vector<8x400xf32>
    %34 = arith.truncf %33 : vector<8x400xf32> to vector<8x400xbf16>
    %c0_20 = arith.constant 0 : index
    %c0_21 = arith.constant 0 : index
    %35 = vector.load %arg9[%c0_20, %c0_21] : memref<400x784xbf16, #tpu.memory_space<vmem>>, vector<400x784xbf16>
    %cst_22 = arith.constant dense<0.000000e+00> : vector<8x784xf32>
    %36 = tpu.matmul %34, %35, %cst_22 {dimension_numbers = #tpu.dot_dimension_numbers<[1], [0], [0], [1], [0, 0, 1, 1], [], []>} : vector<8x400xbf16>, vector<400x784xbf16>, vector<8x784xf32> -> vector<8x784xf32>
    %c0_23 = arith.constant 0 : index
    %c0_24 = arith.constant 0 : index
    %37 = vector.load %arg10[%c0_23, %c0_24] : memref<1x784xbf16, #tpu.memory_space<vmem>>, vector<1x784xbf16>
    %38 = arith.extf %37 : vector<1x784xbf16> to vector<1x784xf32>
    %39 = vector.broadcast %38 : vector<1x784xf32> to vector<8x784xf32>
    %40 = arith.addf %36, %39 : vector<8x784xf32>
    %41 = arith.negf %40 : vector<8x784xf32>
    %42 = math.exp %41 : vector<8x784xf32>
    %cst_25 = arith.constant 1.000000e+00 : f32
    %43 = vector.broadcast %cst_25 : f32 to vector<8x784xf32>
    %44 = arith.addf %43, %42 : vector<8x784xf32>
    %45 = arith.divf %43, %44 : vector<8x784xf32>
    %c0_26 = arith.constant 0 : index
    %c0_27 = arith.constant 0 : index
    %46 = vector.load %arg11[%c0_26, %c0_27] : memref<8x784xf32, #tpu.memory_space<vmem>>, vector<8x784xf32>
    tpu.vector_store %arg11[%c0_26, %c0_27], %45 {strides = array<i32>} : memref<8x784xf32, #tpu.memory_space<vmem>>, vector<8x784xf32>,
    %c0_28 = arith.constant 0 : index
    %c0_29 = arith.constant 0 : index
    %47 = vector.load %arg12[%c0_28, %c0_29] : memref<8x40xf32, #tpu.memory_space<vmem>>, vector<8x40xf32>
    tpu.vector_store %arg12[%c0_28, %c0_29], %17 {strides = array<i32>} : memref<8x40xf32, #tpu.memory_space<vmem>>, vector<8x40xf32>,
    return
  }
  func.func @transform_0(%arg0: i32) -> (i32, i32) {
    %c0_i32 = arith.constant 0 : i32
    %c0_i32_0 = arith.constant 0 : i32
    return %arg0, %c0_i32 : i32, i32
  }
  func.func @transform_1(%arg0: i32) -> (i32, i32) {
    %c0_i32 = arith.constant 0 : i32
    %c0_i32_0 = arith.constant 0 : i32
    return %arg0, %c0_i32 : i32, i32
  }
  func.func @transform_2(%arg0: i32) -> (i32, i32) {
    %c0_i32 = arith.constant 0 : i32
    %c0_i32_0 = arith.constant 0 : i32
    %c0_i32_1 = arith.constant 0 : i32
    return %c0_i32, %c0_i32_0 : i32, i32
  }
  func.func @transform_3(%arg0: i32) -> (i32, i32) {
    %c0_i32 = arith.constant 0 : i32
    %c0_i32_0 = arith.constant 0 : i32
    %c0_i32_1 = arith.constant 0 : i32
    return %c0_i32, %c0_i32_0 : i32, i32
  }
  func.func @transform_4(%arg0: i32) -> (i32, i32) {
    %c0_i32 = arith.constant 0 : i32
    %c0_i32_0 = arith.constant 0 : i32
    %c0_i32_1 = arith.constant 0 : i32
    return %c0_i32, %c0_i32_0 : i32, i32
  }
  func.func @transform_5(%arg0: i32) -> (i32, i32) {
    %c0_i32 = arith.constant 0 : i32
    %c0_i32_0 = arith.constant 0 : i32
    %c0_i32_1 = arith.constant 0 : i32
    return %c0_i32, %c0_i32_0 : i32, i32
  }
  func.func @transform_6(%arg0: i32) -> (i32, i32) {
    %c0_i32 = arith.constant 0 : i32
    %c0_i32_0 = arith.constant 0 : i32
    %c0_i32_1 = arith.constant 0 : i32
    return %c0_i32, %c0_i32_0 : i32, i32
  }
  func.func @transform_7(%arg0: i32) -> (i32, i32) {
    %c0_i32 = arith.constant 0 : i32
    %c0_i32_0 = arith.constant 0 : i32
    %c0_i32_1 = arith.constant 0 : i32
    return %c0_i32, %c0_i32_0 : i32, i32
  }
  func.func @transform_8(%arg0: i32) -> (i32, i32) {
    %c0_i32 = arith.constant 0 : i32
    %c0_i32_0 = arith.constant 0 : i32
    %c0_i32_1 = arith.constant 0 : i32
    return %c0_i32, %c0_i32_0 : i32, i32
  }
  func.func @transform_9(%arg0: i32) -> (i32, i32) {
    %c0_i32 = arith.constant 0 : i32
    %c0_i32_0 = arith.constant 0 : i32
    %c0_i32_1 = arith.constant 0 : i32
    return %c0_i32, %c0_i32_0 : i32, i32
  }
  func.func @transform_10(%arg0: i32) -> (i32, i32) {
    %c0_i32 = arith.constant 0 : i32
    %c0_i32_0 = arith.constant 0 : i32
    return %arg0, %c0_i32 : i32, i32
  }
  func.func @transform_11(%arg0: i32) -> (i32, i32) {
    %c0_i32 = arith.constant 0 : i32
    %c0_i32_0 = arith.constant 0 : i32
    return %arg0, %c0_i32 : i32, i32
  }
}

</mosaic_0001>

<bundles_post_ra>
// kernel: tpu_custom_call.1
= control target key start
LH: loop header
LB: loop body
LE: loop exit
PB: predicated region body
PF: predicated region fallthrough
CT: control target
= control target key end

     0   :  { %17 = vsyncpa [#allocation3], 0  ;;  %vm1270_vm0 = vcmask 130048   ;;  %s6242_s0 = inlined_call_operand.vmem [shape: f32[8,784], index: 0, kind: input, shape index: {}]   ;;  %s6243_s1 = inlined_call_operand.vmem [shape: f32[8,20], index: 1, kind: input, shape index: {}]   ;;  %s6244_s2 = inlined_call_operand.vmem [shape: bf16[784,400], index: 2, kind: input, shape index: {}]   ;;  %s6245_s3 = inlined_call_operand.vmem [shape: bf16[1,400], index: 3, kind: input, shape index: {}]   ;;  %s6246_s4 = inlined_call_operand.vmem [shape: bf16[400,40], index: 4, kind: input, shape index: {}]   ;;  %s6247_s5 = inlined_call_operand.vmem [shape: bf16[1,40], index: 5, kind: input, shape index: {}]   ;;  %s6248_s6 = inlined_call_operand.vmem [shape: bf16[20,400], index: 6, kind: input, shape index: {}]   ;;  %s6249_s7 = inlined_call_operand.vmem [shape: bf16[1,400], index: 7, kind: input, shape index: {}]   ;;  %s6250_s8 = inlined_call_operand.vmem [shape: bf16[400,784], index: 8, kind: input, shape index: {}]   ;;  %s6251_s9 = inlined_call_operand.vmem [shape: bf16[1,784], index: 9, kind: input, shape index: {}]   ;;  %s6252_s10 = inlined_call_operand.hbm [shape: f32[8,784], index: 10, kind: output, shape index: {0}]   ;;  %s6253_s11 = inlined_call_operand.hbm [shape: f32[8,40], index: 11, kind: output, shape index: {1}]  }
   0x1   :  { %v4137_v0 = vld [vmem:[%s6244_s2 + $0xe4] ss:$16 sps:$4 sm:$0xff]   ;;  %v4141_v2 = vld [vmem:[%s6244_s2 + $0xe0] ss:$16 sps:$4 sm:$0xff]   ;;  %v41_v46 = vld [vmem:[%s6242_s0 + $0x8] sm:$0xff] }
   0x2   :  { %v4139_v1 = vld [vmem:[%s6244_s2 + $0x2e4] ss:$16 sps:$4 sm:$0xff]   ;;  %1274 = vmatprep.subr.bf16.mxu0 %v4137_v0  ;;  %v4142_v3 = vld [vmem:[%s6244_s2 + $0x2e0] ss:$16 sps:$4 sm:$0xff]   ;;  %v5001_v49 = vpack.c.bf16 %v41_v46, %v41_v46  ;;  %v43_v50 = vld [vmem:[%s6242_s0 + $0x18] sm:$0xff] }
   0x3   :  { %1315 = vmatprep.subr.bf16.mxu1 %v4139_v1  ;;  %v4143_v4 = vld [vmem:[%s6244_s2 + $0xc4] ss:$16 sps:$4 sm:$0xff]   ;;  %1275 = vmatpush1.bf16.msra.mxu0 %v4141_v2  ;;  %v4147_v6 = vld [vmem:[%s6244_s2 + $0xc0] ss:$16 sps:$4 sm:$0xff]   ;;  %v5009_v52 = vpack.c.bf16 %v43_v50, %v43_v50 }
   0x4   :  { %1316 = vmatpush1.bf16.msra.mxu1 %v4142_v3  ;;  %v4145_v5 = vld [vmem:[%s6244_s2 + $0x2c4] ss:$16 sps:$4 sm:$0xff]   ;;  %1276 = vmatprep.subr.bf16.mxu0 %v4143_v4  ;;  %v4148_v7 = vld [vmem:[%s6244_s2 + $0x2c0] ss:$16 sps:$4 sm:$0xff]  }
   0x5   :  { %1317 = vmatprep.subr.bf16.mxu1 %v4145_v5  ;;  %v4149_v8 = vld [vmem:[%s6244_s2 + $0xa4] ss:$16 sps:$4 sm:$0xff]   ;;  %v4153_v10 = vld [vmem:[%s6244_s2 + $0xa0] ss:$16 sps:$4 sm:$0xff]   ;;  %1306 = vmatprep.mubr.bf16.mxu0 %v5001_v49 }
   0x6   :  { %v4151_v9 = vld [vmem:[%s6244_s2 + $0x2a4] ss:$16 sps:$4 sm:$0xff]   ;;  %v4154_v11 = vld [vmem:[%s6244_s2 + $0x2a0] ss:$16 sps:$4 sm:$0xff]   ;;  %1347 = vmatprep.mubr.bf16.mxu1 %v5009_v52 }
   0x7   :  { %1277 = vmatpush1.bf16.msra.mxu0 %v4147_v6  ;;  %v4155_v12 = vld [vmem:[%s6244_s2 + $0x84] ss:$16 sps:$4 sm:$0xff]   ;;  %v4159_v14 = vld [vmem:[%s6244_s2 + $0x80] ss:$16 sps:$4 sm:$0xff]  }
   0x8   :  { %1318 = vmatpush1.bf16.msra.mxu1 %v4148_v7  ;;  %1278 = vmatprep.subr.bf16.mxu0 %v4149_v8  ;;  %v4157_v13 = vld [vmem:[%s6244_s2 + $0x284] ss:$16 sps:$4 sm:$0xff]   ;;  %v4160_v15 = vld [vmem:[%s6244_s2 + $0x280] ss:$16 sps:$4 sm:$0xff]  }
   0x9   :  { %1319 = vmatprep.subr.bf16.mxu1 %v4151_v9  ;;  %v4161_v16 = vld [vmem:[%s6244_s2 + $0x64] ss:$16 sps:$4 sm:$0xff]   ;;  %v4165_v18 = vld [vmem:[%s6244_s2 + $0x60] ss:$16 sps:$4 sm:$0xff]  }
   0xa   :  { %v4163_v17 = vld [vmem:[%s6244_s2 + $0x264] ss:$16 sps:$4 sm:$0xff]   ;;  %v4166_v19 = vld [vmem:[%s6244_s2 + $0x260] ss:$16 sps:$4 sm:$0xff]  }
   0xb   :  { %1279 = vmatpush1.bf16.msra.mxu0 %v4153_v10  ;;  %v4167_v20 = vld [vmem:[%s6244_s2 + $0x44] ss:$16 sps:$4 sm:$0xff]   ;;  %v4171_v22 = vld [vmem:[%s6244_s2 + $0x40] ss:$16 sps:$4 sm:$0xff]  }
   0xc   :  { %1320 = vmatpush1.bf16.msra.mxu1 %v4154_v11  ;;  %1280 = vmatprep.subr.bf16.mxu0 %v4155_v12  ;;  %v4169_v21 = vld [vmem:[%s6244_s2 + $0x244] ss:$16 sps:$4 sm:$0xff]   ;;  %v4172_v23 = vld [vmem:[%s6244_s2 + $0x240] ss:$16 sps:$4 sm:$0xff]  }
   0xd   :  { %1321 = vmatprep.subr.bf16.mxu1 %v4157_v13  ;;  %v4173_v24 = vld [vmem:[%s6244_s2 + $0x24] ss:$16 sps:$4 sm:$0xff]   ;;  %v4177_v26 = vld [vmem:[%s6244_s2 + $0x20] ss:$16 sps:$4 sm:$0xff]   ;;  %v4244_v13 = vld [vmem:[%s6244_s2 + $0xec] ss:$16 sps:$4 sm:$0xff]  }
   0xe   :  { %v4175_v25 = vld [vmem:[%s6244_s2 + $0x224] ss:$16 sps:$4 sm:$0xff]   ;;  %v4178_v27 = vld [vmem:[%s6244_s2 + $0x220] ss:$16 sps:$4 sm:$0xff]  }
   0xf   :  { %1281 = vmatpush1.bf16.msra.mxu0 %v4159_v14  ;;  %v4179_v28 = vld [vmem:[%s6244_s2 + $0x4] ss:$16 sps:$4 sm:$0xff]   ;;  %v4183_v30 = vld [vmem:[%s6244_s2] ss:$16 sps:$4 sm:$0xff]  }
  0x10   :  { %1322 = vmatpush1.bf16.msra.mxu1 %v4160_v15  ;;  %1282 = vmatprep.subr.bf16.mxu0 %v4161_v16  ;;  %v4181_v29 = vld [vmem:[%s6244_s2 + $0x204] ss:$16 sps:$4 sm:$0xff]   ;;  %v4184_v31 = vld [vmem:[%s6244_s2 + $0x200] ss:$16 sps:$4 sm:$0xff]   ;;  %v4790_v16 = vmov 0  }
  0x11   :  { %1323 = vmatprep.subr.bf16.mxu1 %v4163_v17  ;;  %v4185_v32 = vld [vmem:[%s6244_s2 + $0x1e4] ss:$16 sps:$4 sm:$0xff]   ;;  %v4189_v34 = vld [vmem:[%s6244_s2 + $0x1e0] ss:$16 sps:$4 sm:$0xff]  }
  0x12   :  { %v4187_v33 = vld [vmem:[%s6244_s2 + $0x3e4] ss:$16 sps:$4 sm:$0xff]   ;;  %v4190_v35 = vld [vmem:[%s6244_s2 + $0x3e0] ss:$16 sps:$4 sm:$0xff]  }
  0x13   :  { %1283 = vmatpush1.bf16.msra.mxu0 %v4165_v18  ;;  %v4191_v36 = vld [vmem:[%s6244_s2 + $0x1c4] ss:$16 sps:$4 sm:$0xff]   ;;  %v4195_v38 = vld [vmem:[%s6244_s2 + $0x1c0] ss:$16 sps:$4 sm:$0xff]   ;;  %v4242_v18 = vld [vmem:[%s6244_s2 + $0xe8] ss:$16 sps:$4 sm:$0xff]  }
  0x14   :  { %1324 = vmatpush1.bf16.msra.mxu1 %v4166_v19  ;;  %1284 = vmatprep.subr.bf16.mxu0 %v4167_v20  ;;  %v4193_v37 = vld [vmem:[%s6244_s2 + $0x3c4] ss:$16 sps:$4 sm:$0xff]   ;;  %v4196_v39 = vld [vmem:[%s6244_s2 + $0x3c0] ss:$16 sps:$4 sm:$0xff]  }
  0x15   :  { %1325 = vmatprep.subr.bf16.mxu1 %v4169_v21  ;;  %v4197_v40 = vld [vmem:[%s6244_s2 + $0x1a4] ss:$16 sps:$4 sm:$0xff]   ;;  %v4201_v42 = vld [vmem:[%s6244_s2 + $0x1a0] ss:$16 sps:$4 sm:$0xff]   ;;  %v4250_v21 = vld [vmem:[%s6244_s2 + $0xcc] ss:$16 sps:$4 sm:$0xff]  }
  0x16   :  { %v4199_v41 = vld [vmem:[%s6244_s2 + $0x3a4] ss:$16 sps:$4 sm:$0xff]   ;;  %v4202_v43 = vld [vmem:[%s6244_s2 + $0x3a0] ss:$16 sps:$4 sm:$0xff]  }
  0x17   :  { %1285 = vmatpush1.bf16.msra.mxu0 %v4171_v22  ;;  %v4203_v44 = vld [vmem:[%s6244_s2 + $0x184] ss:$16 sps:$4 sm:$0xff]   ;;  %v4207_v47 = vld [vmem:[%s6244_s2 + $0x180] ss:$16 sps:$4 sm:$0xff]  }
  0x18   :  { %1326 = vmatpush1.bf16.msra.mxu1 %v4172_v23  ;;  %1286 = vmatprep.subr.bf16.mxu0 %v4173_v24  ;;  %v4205_v45 = vld [vmem:[%s6244_s2 + $0x384] ss:$16 sps:$4 sm:$0xff]   ;;  %v4208_v48 = vld [vmem:[%s6244_s2 + $0x380] ss:$16 sps:$4 sm:$0xff]   ;;  %v4248_v23 = vld [vmem:[%s6244_s2 + $0xc8] ss:$16 sps:$4 sm:$0xff]  }
  0x19   :  { %1327 = vmatprep.subr.bf16.mxu1 %v4175_v25  ;;  %v4209_v51 = vld [vmem:[%s6244_s2 + $0x164] ss:$16 sps:$4 sm:$0xff]   ;;  %v4213_v54 = vld [vmem:[%s6244_s2 + $0x160] ss:$16 sps:$4 sm:$0xff]   ;;  %v4256_v25 = vld [vmem:[%s6244_s2 + $0xac] ss:$16 sps:$4 sm:$0xff]  }
  0x1a   :  { %v4211_v53 = vld [vmem:[%s6244_s2 + $0x364] ss:$16 sps:$4 sm:$0xff]   ;;  %v4214_v55 = vld [vmem:[%s6244_s2 + $0x360] ss:$16 sps:$4 sm:$0xff]  }
  0x1b   :  { %1287 = vmatpush1.bf16.msra.mxu0 %v4177_v26  ;;  %v4215_v56 = vld [vmem:[%s6244_s2 + $0x144] ss:$16 sps:$4 sm:$0xff]   ;;  %v4219_v58 = vld [vmem:[%s6244_s2 + $0x140] ss:$16 sps:$4 sm:$0xff]  }
  0x1c   :  { %1328 = vmatpush1.bf16.msra.mxu1 %v4178_v27  ;;  %1288 = vmatprep.subr.bf16.mxu0 %v4179_v28  ;;  %v4217_v57 = vld [vmem:[%s6244_s2 + $0x344] ss:$16 sps:$4 sm:$0xff]   ;;  %v4220_v59 = vld [vmem:[%s6244_s2 + $0x340] ss:$16 sps:$4 sm:$0xff]   ;;  %v4254_v27 = vld [vmem:[%s6244_s2 + $0xa8] ss:$16 sps:$4 sm:$0xff]  }
  0x1d   :  { %1329 = vmatprep.subr.bf16.mxu1 %v4181_v29  ;;  %v4221_v60 = vld [vmem:[%s6244_s2 + $0x124] ss:$16 sps:$4 sm:$0xff]   ;;  %v4225_v62 = vld [vmem:[%s6244_s2 + $0x120] ss:$16 sps:$4 sm:$0xff]   ;;  %v4262_v29 = vld [vmem:[%s6244_s2 + $0x8c] ss:$16 sps:$4 sm:$0xff]  }
  0x1e   :  { %v4223_v61 = vld [vmem:[%s6244_s2 + $0x324] ss:$16 sps:$4 sm:$0xff]   ;;  %v4226_v63 = vld [vmem:[%s6244_s2 + $0x320] ss:$16 sps:$4 sm:$0xff]  }
  0x1f   :  { %1289 = vmatpush1.bf16.msra.mxu0 %v4183_v30  ;;  %v4227_v0 = vld [vmem:[%s6244_s2 + $0x104] ss:$16 sps:$4 sm:$0xff]   ;;  %v4231_v2 = vld [vmem:[%s6244_s2 + $0x100] ss:$16 sps:$4 sm:$0xff]  }
  0x20   :  { %1330 = vmatpush1.bf16.msra.mxu1 %v4184_v31  ;;  %1290 = vmatprep.subr.bf16.mxu0 %v4185_v32  ;;  %v4229_v1 = vld [vmem:[%s6244_s2 + $0x304] ss:$16 sps:$4 sm:$0xff]   ;;  %v4232_v3 = vld [vmem:[%s6244_s2 + $0x300] ss:$16 sps:$4 sm:$0xff]   ;;  %v4260_v31 = vld [vmem:[%s6244_s2 + $0x88] ss:$16 sps:$4 sm:$0xff]  }
  0x21   :  { %1331 = vmatprep.subr.bf16.mxu1 %v4187_v33  ;;  %v40_v4 = vld [vmem:[%s6242_s0] sm:$0xff]  ;;  %v42_v5 = vld [vmem:[%s6242_s0 + $0x10] sm:$0xff]  ;;  %v4268_v33 = vld [vmem:[%s6244_s2 + $0x6c] ss:$16 sps:$4 sm:$0xff]  }
  0x22   :  { %v4235_v6 = vld [vmem:[%s6244_s2 + $0x4e4] ss:$16 sps:$4 sm:$0xff]   ;;  %v5070_v8 = vpack.c.bf16 %v40_v4, %v40_v4  ;;  %v5072_v9 = vpack.c.bf16 %v42_v5, %v42_v5  ;;  %v4233_v10 = vld [vmem:[%s6244_s2 + $0x4e0] ss:$16 sps:$4 sm:$0xff]   ;;  %v4316_v4 = vld [vmem:[%s6244_s2 + $0x16c] ss:$16 sps:$4 sm:$0xff]  }
  0x23   :  { %1291 = vmatpush2.bf16.msra.mxu0 %v4189_v34  ;;  %v4238_v7 = vld [vmem:[%s6244_s2 + $0x604] ss:$16 sps:$4 sm:$0xff]   ;;  %v4236_v11 = vld [vmem:[%s6244_s2 + $0x600] ss:$16 sps:$4 sm:$0xff]  }
  0x24   :  { %1332 = vmatpush2.bf16.msra.mxu1 %v4190_v35  ;;  %1292 = vmatprep.subr.bf16.mxu0 %v4191_v36  ;;  %v4241_v12 = vld [vmem:[%s6244_s2 + $0x4c4] ss:$16 sps:$4 sm:$0xff]   ;;  %v4239_v14 = vld [vmem:[%s6244_s2 + $0x4c0] ss:$16 sps:$4 sm:$0xff]   ;;  %v45_v35 = vld [vmem:[%s6242_s0 + $0x28] sm:$0xff] }
  0x25   :  { %1333 = vmatprep.subr.bf16.mxu1 %v4193_v37  ;;  %v46_v15 = vld [vmem:[%s6242_s0 + $0x30] sm:$0xff]  ;;  %v5154_v36 = vpack.c.bf16 %v45_v35, %v45_v35  ;;  %v4266_v37 = vld [vmem:[%s6244_s2 + $0x68] ss:$16 sps:$4 sm:$0xff]  }
  0x26   :  { %v4247_v17 = vld [vmem:[%s6244_s2 + $0x4a4] ss:$16 sps:$4 sm:$0xff]   ;;  %v5101_v19 = vpack.c.bf16 %v46_v15, %v46_v15  ;;  %v4245_v20 = vld [vmem:[%s6244_s2 + $0x4a0] ss:$16 sps:$4 sm:$0xff]   ;;  %v4350_v35 = vld [vmem:[%s6244_s2 + $0x4a8] ss:$16 sps:$4 sm:$0xff]  }
  0x27   :  { %1293 = vmatpush2.bf16.msra.mxu0 %v4195_v38  ;;  %v4253_v22 = vld [vmem:[%s6244_s2 + $0x484] ss:$16 sps:$4 sm:$0xff]   ;;  %v4251_v24 = vld [vmem:[%s6244_s2 + $0x480] ss:$16 sps:$4 sm:$0xff]  }
  0x28   :  { %1334 = vmatpush2.bf16.msra.mxu1 %v4196_v39  ;;  %1294 = vmatprep.subr.bf16.mxu0 %v4197_v40  ;;  %v4259_v26 = vld [vmem:[%s6244_s2 + $0x464] ss:$16 sps:$4 sm:$0xff]   ;;  %v4257_v28 = vld [vmem:[%s6244_s2 + $0x460] ss:$16 sps:$4 sm:$0xff]   ;;  %v4274_v39 = vld [vmem:[%s6244_s2 + $0x4c] ss:$16 sps:$4 sm:$0xff]  }
  0x29   :  { %1335 = vmatprep.subr.bf16.mxu1 %v4199_v41  ;;  %v4265_v30 = vld [vmem:[%s6244_s2 + $0x444] ss:$16 sps:$4 sm:$0xff]   ;;  %v4263_v32 = vld [vmem:[%s6244_s2 + $0x440] ss:$16 sps:$4 sm:$0xff]   ;;  %v4272_v41 = vld [vmem:[%s6244_s2 + $0x48] ss:$16 sps:$4 sm:$0xff]  }
  0x2a   :  { %v4271_v34 = vld [vmem:[%s6244_s2 + $0x424] ss:$16 sps:$4 sm:$0xff]   ;;  %v4269_v38 = vld [vmem:[%s6244_s2 + $0x420] ss:$16 sps:$4 sm:$0xff]  }
  0x2b   :  { %1295 = vmatpush2.bf16.msra.mxu0 %v4201_v42  ;;  %v4277_v40 = vld [vmem:[%s6244_s2 + $0x404] ss:$16 sps:$4 sm:$0xff]   ;;  %v4275_v42 = vld [vmem:[%s6244_s2 + $0x400] ss:$16 sps:$4 sm:$0xff]  }
  0x2c   :  { %1336 = vmatpush2.bf16.msra.mxu1 %v4202_v43  ;;  %1296 = vmatprep.subr.bf16.mxu0 %v4203_v44  ;;  %v4280_v43 = vld [vmem:[%s6244_s2 + $0x2c] ss:$16 sps:$4 sm:$0xff]   ;;  %v4283_v44 = vld [vmem:[%s6244_s2 + $0x5e4] ss:$16 sps:$4 sm:$0xff]   ;;  %v4281_v46 = vld [vmem:[%s6244_s2 + $0x5e0] ss:$16 sps:$4 sm:$0xff]  }
  0x2d   :  { %1337 = vmatprep.subr.bf16.mxu1 %v4205_v45  ;;  %v4278_v45 = vld [vmem:[%s6244_s2 + $0x28] ss:$16 sps:$4 sm:$0xff]   ;;  %v4287_v50 = vld [vmem:[%s6244_s2 + $0x5c0] ss:$16 sps:$4 sm:$0xff]   ;;  %v4319_v5 = vld [vmem:[%s6244_s2 + $0x524] ss:$16 sps:$4 sm:$0xff]  }
  0x2e   :  { %v44_v15 = vld [vmem:[%s6242_s0 + $0x20] sm:$0xff] }
  0x2f   :  { %1297 = vmatpush2.bf16.msra.mxu0 %v4207_v47  ;;  %v4286_v47 = vld [vmem:[%s6244_s2 + $0xc] ss:$16 sps:$4 sm:$0xff]  }
  0x30   :  { %1338 = vmatpush2.bf16.msra.mxu1 %v4208_v48  ;;  %1298 = vmatprep.subr.bf16.mxu0 %v4209_v51  ;;  %v4289_v48 = vld [vmem:[%s6244_s2 + $0x5c4] ss:$16 sps:$4 sm:$0xff]   ;;  %v4292_v51 = vld [vmem:[%s6244_s2 + $0x1ec] ss:$16 sps:$4 sm:$0xff]  }
  0x31   :  { %1339 = vmatprep.subr.bf16.mxu1 %v4211_v53  ;;  %v4295_v53 = vld [vmem:[%s6244_s2 + $0x5a4] ss:$16 sps:$4 sm:$0xff]  }
  0x33   :  { %1299 = vmatpush2.bf16.msra.mxu0 %v4213_v54  ;;  %v4290_v54 = vld [vmem:[%s6244_s2 + $0x1e8] ss:$16 sps:$4 sm:$0xff]  }
  0x34   :  { %1340 = vmatpush2.bf16.msra.mxu1 %v4214_v55  ;;  %1300 = vmatprep.subr.bf16.mxu0 %v4215_v56  ;;  %v4293_v55 = vld [vmem:[%s6244_s2 + $0x5a0] ss:$16 sps:$4 sm:$0xff]   ;;  %v4298_v56 = vld [vmem:[%s6244_s2 + $0x1cc] ss:$16 sps:$4 sm:$0xff]  }
  0x35   :  { %1341 = vmatprep.subr.bf16.mxu1 %v4217_v57  ;;  %v4301_v57 = vld [vmem:[%s6244_s2 + $0x584] ss:$16 sps:$4 sm:$0xff]  }
  0x37   :  { %1301 = vmatpush2.bf16.msra.mxu0 %v4219_v58  ;;  %v4296_v58 = vld [vmem:[%s6244_s2 + $0x1c8] ss:$16 sps:$4 sm:$0xff]  }
  0x38   :  { %1342 = vmatpush2.bf16.msra.mxu1 %v4220_v59  ;;  %1302 = vmatprep.subr.bf16.mxu0 %v4221_v60  ;;  %v4299_v59 = vld [vmem:[%s6244_s2 + $0x580] ss:$16 sps:$4 sm:$0xff]   ;;  %v4304_v60 = vld [vmem:[%s6244_s2 + $0x1ac] ss:$16 sps:$4 sm:$0xff]  }
  0x39   :  { %1343 = vmatprep.subr.bf16.mxu1 %v4223_v61  ;;  %v4307_v61 = vld [vmem:[%s6244_s2 + $0x564] ss:$16 sps:$4 sm:$0xff]  }
  0x3b   :  { %1303 = vmatpush2.bf16.msra.mxu0 %v4225_v62  ;;  %v4302_v62 = vld [vmem:[%s6244_s2 + $0x1a8] ss:$16 sps:$4 sm:$0xff]  }
  0x3c   :  { %1344 = vmatpush2.bf16.msra.mxu1 %v4226_v63  ;;  %1304 = vmatprep.subr.bf16.mxu0 %v4227_v0  ;;  %v4305_v63 = vld [vmem:[%s6244_s2 + $0x560] ss:$16 sps:$4 sm:$0xff]   ;;  %v4310_v0 = vld [vmem:[%s6244_s2 + $0x18c] ss:$16 sps:$4 sm:$0xff]  }
  0x3d   :  { %1345 = vmatprep.subr.bf16.mxu1 %v4229_v1  ;;  %v4313_v1 = vld [vmem:[%s6244_s2 + $0x544] ss:$16 sps:$4 sm:$0xff]  }
  0x3f   :  { %1305 = vmatpush2.bf16.msra.mxu0 %v4231_v2  ;;  %v4308_v2 = vld [vmem:[%s6244_s2 + $0x188] ss:$16 sps:$4 sm:$0xff]  }
  0x40   :  { %1346 = vmatpush2.bf16.msra.mxu1 %v4232_v3  ;;  %1356 = vmatprep.subr.bf16.mxu0 %v4235_v6  ;;  %v4311_v3 = vld [vmem:[%s6244_s2 + $0x540] ss:$16 sps:$4 sm:$0xff]   ;;  %v4314_v6 = vld [vmem:[%s6244_s2 + $0x168] ss:$16 sps:$4 sm:$0xff]  }
  0x41   :  { %1411 = vmatprep.subr.bf16.mxu1 %v4238_v7  ;;  %v4317_v7 = vld [vmem:[%s6244_s2 + $0x520] ss:$16 sps:$4 sm:$0xff]  }
  0x42   :  { %1307 = vmatmul.mubr.bf16.vlgmr.msra.gmra.mxu0 %v5070_v8 }
  0x43   :  { %1348 = vmatmul.mubr.bf16.vlgmr.msra.gmra.mxu1 %v5072_v9  ;;  %1357 = vmatpush1.bf16.msra.mxu0 %v4233_v10  ;;  %v4322_v10 = vld [vmem:[%s6244_s2 + $0x14c] ss:$16 sps:$4 sm:$0xff]  }
  0x44   :  { %1412 = vmatpush1.bf16.msra.mxu1 %v4236_v11  ;;  %1358 = vmatprep.subr.bf16.mxu0 %v4241_v12  ;;  %v4325_v11 = vld [vmem:[%s6244_s2 + $0x504] ss:$16 sps:$4 sm:$0xff]   ;;  %v4320_v12 = vld [vmem:[%s6244_s2 + $0x148] ss:$16 sps:$4 sm:$0xff]  }
  0x45   :  { %1429 = vmatprep.mubr.bf16.mxu1 %v4790_v16  ;;  %1438 = vmatprep.subr.bf16.mxu1 %v4244_v13  ;;  %v4323_v13 = vld [vmem:[%s6244_s2 + $0x500] ss:$16 sps:$4 sm:$0xff]  }
  0x46   :  { %1388 = vmatprep.mubr.bf16.mxu0 %v5154_v36 }
  0x47   :  { %1359 = vmatpush1.bf16.msra.mxu0 %v4239_v14  ;;  %v4328_v14 = vld [vmem:[%s6244_s2 + $0x12c] ss:$16 sps:$4 sm:$0xff]  }
  0x48   :  { %1360 = vmatprep.subr.bf16.mxu0 %v4247_v17  ;;  %v4331_v17 = vld [vmem:[%s6244_s2 + $0x2ec] ss:$16 sps:$4 sm:$0xff]  }
  0x4b   :  { %3863 = vmatmul.mubr.msk.bf16.vlgmr.msra.gmra.mxu1 %vm1270_vm0, %v5101_v19  ;;  %1361 = vmatpush1.bf16.msra.mxu0 %v4245_v20  ;;  %v5283_v20 = vpack.c.bf16 %v44_v15, %v44_v15  ;;  %v4418_v15 = vld [vmem:[%s6244_s2 + $0x54c] ss:$16 sps:$4 sm:$0xff]  }
  0x4c   :  { %1439 = vmatpush1.bf16.msra.mxu1 %v4242_v18  ;;  %1362 = vmatprep.subr.bf16.mxu0 %v4253_v22  ;;  %v4326_v18 = vld [vmem:[%s6244_s2 + $0x128] ss:$16 sps:$4 sm:$0xff]   ;;  %v4334_v22 = vld [vmem:[%s6244_s2 + $0x10c] ss:$16 sps:$4 sm:$0xff]  }
  0x4d   :  { %1440 = vmatprep.subr.bf16.mxu1 %v4250_v21  ;;  %1470 = vmatprep.mubr.bf16.mxu1 %v5001_v49  ;;  %v4284_v49 = vld [vmem:[%s6244_s2 + $0x8] ss:$16 sps:$4 sm:$0xff]  }
  0x4e   :  { %v4329_v21 = vld [vmem:[%s6244_s2 + $0x2e8] ss:$16 sps:$4 sm:$0xff]  }
  0x4f   :  { %1363 = vmatpush1.bf16.msra.mxu0 %v4251_v24  ;;  %v4332_v24 = vld [vmem:[%s6244_s2 + $0x108] ss:$16 sps:$4 sm:$0xff]  }
  0x50   :  { %1441 = vmatpush1.bf16.msra.mxu1 %v4248_v23  ;;  %1364 = vmatprep.subr.bf16.mxu0 %v4259_v26  ;;  %v4337_v23 = vld [vmem:[%s6244_s2 + $0x2cc] ss:$16 sps:$4 sm:$0xff]  }
  0x51   :  { %1442 = vmatprep.subr.bf16.mxu1 %v4256_v25  ;;  %v4335_v25 = vld [vmem:[%s6244_s2 + $0x2c8] ss:$16 sps:$4 sm:$0xff]   ;;  %v4340_v26 = vld [vmem:[%s6244_s2 + $0x4ec] ss:$16 sps:$4 sm:$0xff]  }
  0x53   :  { %1365 = vmatpush1.bf16.msra.mxu0 %v4257_v28  ;;  %v4338_v28 = vld [vmem:[%s6244_s2 + $0x4e8] ss:$16 sps:$4 sm:$0xff]  }
  0x54   :  { %1443 = vmatpush1.bf16.msra.mxu1 %v4254_v27  ;;  %1366 = vmatprep.subr.bf16.mxu0 %v4265_v30  ;;  %v4343_v27 = vld [vmem:[%s6244_s2 + $0x2ac] ss:$16 sps:$4 sm:$0xff]  }
  0x55   :  { %1444 = vmatprep.subr.bf16.mxu1 %v4262_v29  ;;  %v4341_v29 = vld [vmem:[%s6244_s2 + $0x2a8] ss:$16 sps:$4 sm:$0xff]   ;;  %v4346_v30 = vld [vmem:[%s6244_s2 + $0x4cc] ss:$16 sps:$4 sm:$0xff]  }
  0x57   :  { %1367 = vmatpush1.bf16.msra.mxu0 %v4263_v32  ;;  %v4344_v32 = vld [vmem:[%s6244_s2 + $0x4c8] ss:$16 sps:$4 sm:$0xff]  }
  0x58   :  { %1445 = vmatpush1.bf16.msra.mxu1 %v4260_v31  ;;  %1368 = vmatprep.subr.bf16.mxu0 %v4271_v34  ;;  %v4349_v31 = vld [vmem:[%s6244_s2 + $0x28c] ss:$16 sps:$4 sm:$0xff]  }
  0x59   :  { %1446 = vmatprep.subr.bf16.mxu1 %v4268_v33  ;;  %v4352_v33 = vld [vmem:[%s6244_s2 + $0x4ac] ss:$16 sps:$4 sm:$0xff]  }
  0x5a   :  { %v4355_v34 = vld [vmem:[%s6244_s2 + $0x26c] ss:$16 sps:$4 sm:$0xff]  }
  0x5b   :  { %1369 = vmatpush1.bf16.msra.mxu0 %v4269_v38  ;;  %v4361_v38 = vld [vmem:[%s6244_s2 + $0x24c] ss:$16 sps:$4 sm:$0xff]  }
  0x5c   :  { %1447 = vmatpush1.bf16.msra.mxu1 %v4266_v37  ;;  %1370 = vmatprep.subr.bf16.mxu0 %v4277_v40  ;;  %v4358_v37 = vld [vmem:[%s6244_s2 + $0x48c] ss:$16 sps:$4 sm:$0xff]  }
  0x5d   :  { %1448 = vmatprep.subr.bf16.mxu1 %v4274_v39  ;;  %v4356_v39 = vld [vmem:[%s6244_s2 + $0x488] ss:$16 sps:$4 sm:$0xff]   ;;  %v4364_v40 = vld [vmem:[%s6244_s2 + $0x46c] ss:$16 sps:$4 sm:$0xff]  }
  0x5f   :  { %1371 = vmatpush1.bf16.msra.mxu0 %v4275_v42  ;;  %v4362_v42 = vld [vmem:[%s6244_s2 + $0x468] ss:$16 sps:$4 sm:$0xff]  }
  0x60   :  { %1449 = vmatpush1.bf16.msra.mxu1 %v4272_v41  ;;  %1372 = vmatprep.subr.bf16.mxu0 %v4283_v44  ;;  %v4367_v41 = vld [vmem:[%s6244_s2 + $0x22c] ss:$16 sps:$4 sm:$0xff]  }
  0x61   :  { %1450 = vmatprep.subr.bf16.mxu1 %v4280_v43  ;;  %v4365_v43 = vld [vmem:[%s6244_s2 + $0x228] ss:$16 sps:$4 sm:$0xff]   ;;  %v4370_v44 = vld [vmem:[%s6244_s2 + $0x44c] ss:$16 sps:$4 sm:$0xff]  }
  0x63   :  { %1373 = vmatpush2.bf16.msra.mxu0 %v4281_v46  ;;  %v4368_v46 = vld [vmem:[%s6244_s2 + $0x448] ss:$16 sps:$4 sm:$0xff]  }
  0x64   :  { %1451 = vmatpush1.bf16.msra.mxu1 %v4278_v45  ;;  %1374 = vmatprep.subr.bf16.mxu0 %v4289_v48  ;;  %v4373_v45 = vld [vmem:[%s6244_s2 + $0x20c] ss:$16 sps:$4 sm:$0xff]  }
  0x65   :  { %1452 = vmatprep.subr.bf16.mxu1 %v4286_v47  ;;  %v4371_v47 = vld [vmem:[%s6244_s2 + $0x208] ss:$16 sps:$4 sm:$0xff]   ;;  %v4376_v48 = vld [vmem:[%s6244_s2 + $0x42c] ss:$16 sps:$4 sm:$0xff]  }
  0x67   :  { %1375 = vmatpush2.bf16.msra.mxu0 %v4287_v50  ;;  %v4374_v50 = vld [vmem:[%s6244_s2 + $0x428] ss:$16 sps:$4 sm:$0xff]  }
  0x68   :  { %1453 = vmatpush1.bf16.msra.mxu1 %v4284_v49  ;;  %1376 = vmatprep.subr.bf16.mxu0 %v4295_v53  ;;  %v4379_v49 = vld [vmem:[%s6244_s2 + $0x3ec] ss:$16 sps:$4 sm:$0xff]  }
  0x69   :  { %1454 = vmatprep.subr.bf16.mxu1 %v4292_v51  ;;  %v4377_v51 = vld [vmem:[%s6244_s2 + $0x3e8] ss:$16 sps:$4 sm:$0xff]   ;;  %v4382_v53 = vld [vmem:[%s6244_s2 + $0x40c] ss:$16 sps:$4 sm:$0xff]  }
  0x6b   :  { %1377 = vmatpush2.bf16.msra.mxu0 %v4293_v55  ;;  %v4380_v55 = vld [vmem:[%s6244_s2 + $0x408] ss:$16 sps:$4 sm:$0xff]  }
  0x6c   :  { %1455 = vmatpush2.bf16.msra.mxu1 %v4290_v54  ;;  %1378 = vmatprep.subr.bf16.mxu0 %v4301_v57  ;;  %v4385_v54 = vld [vmem:[%s6244_s2 + $0x3cc] ss:$16 sps:$4 sm:$0xff]  }
  0x6d   :  { %1456 = vmatprep.subr.bf16.mxu1 %v4298_v56  ;;  %v4383_v56 = vld [vmem:[%s6244_s2 + $0x3c8] ss:$16 sps:$4 sm:$0xff]   ;;  %v4388_v57 = vld [vmem:[%s6244_s2 + $0x5ec] ss:$16 sps:$4 sm:$0xff]  }
  0x6f   :  { %1379 = vmatpush2.bf16.msra.mxu0 %v4299_v59  ;;  %v4386_v59 = vld [vmem:[%s6244_s2 + $0x5e8] ss:$16 sps:$4 sm:$0xff]  }
  0x70   :  { %1457 = vmatpush2.bf16.msra.mxu1 %v4296_v58  ;;  %1380 = vmatprep.subr.bf16.mxu0 %v4307_v61  ;;  %v4391_v58 = vld [vmem:[%s6244_s2 + $0x3ac] ss:$16 sps:$4 sm:$0xff]  }
  0x71   :  { %1458 = vmatprep.subr.bf16.mxu1 %v4304_v60  ;;  %v4389_v60 = vld [vmem:[%s6244_s2 + $0x3a8] ss:$16 sps:$4 sm:$0xff]   ;;  %v4394_v61 = vld [vmem:[%s6244_s2 + $0x5cc] ss:$16 sps:$4 sm:$0xff]  }
  0x73   :  { %1381 = vmatpush2.bf16.msra.mxu0 %v4305_v63  ;;  %v4392_v63 = vld [vmem:[%s6244_s2 + $0x5c8] ss:$16 sps:$4 sm:$0xff]  }
  0x74   :  { %1459 = vmatpush2.bf16.msra.mxu1 %v4302_v62  ;;  %1382 = vmatprep.subr.bf16.mxu0 %v4313_v1  ;;  %v4397_v62 = vld [vmem:[%s6244_s2 + $0x38c] ss:$16 sps:$4 sm:$0xff]  }
  0x75   :  { %1460 = vmatprep.subr.bf16.mxu1 %v4310_v0  ;;  %v4395_v0 = vld [vmem:[%s6244_s2 + $0x388] ss:$16 sps:$4 sm:$0xff]   ;;  %v4400_v1 = vld [vmem:[%s6244_s2 + $0x5ac] ss:$16 sps:$4 sm:$0xff]  }
  0x77   :  { %1383 = vmatpush2.bf16.msra.mxu0 %v4311_v3  ;;  %v4398_v3 = vld [vmem:[%s6244_s2 + $0x5a8] ss:$16 sps:$4 sm:$0xff]  }
  0x78   :  { %1461 = vmatpush2.bf16.msra.mxu1 %v4308_v2  ;;  %1384 = vmatprep.subr.bf16.mxu0 %v4319_v5  ;;  %v4403_v2 = vld [vmem:[%s6244_s2 + $0x36c] ss:$16 sps:$4 sm:$0xff]  }
  0x79   :  { %1462 = vmatprep.subr.bf16.mxu1 %v4316_v4  ;;  %v4401_v4 = vld [vmem:[%s6244_s2 + $0x368] ss:$16 sps:$4 sm:$0xff]   ;;  %v4406_v5 = vld [vmem:[%s6244_s2 + $0x58c] ss:$16 sps:$4 sm:$0xff]  }
  0x7b   :  { %1385 = vmatpush2.bf16.msra.mxu0 %v4317_v7  ;;  %v4404_v7 = vld [vmem:[%s6244_s2 + $0x588] ss:$16 sps:$4 sm:$0xff]  }
  0x7c   :  { %1463 = vmatpush2.bf16.msra.mxu1 %v4314_v6  ;;  %1386 = vmatprep.subr.bf16.mxu0 %v4325_v11  ;;  %v4409_v6 = vld [vmem:[%s6244_s2 + $0x34c] ss:$16 sps:$4 sm:$0xff]  }
  0x7d   :  { %1464 = vmatprep.subr.bf16.mxu1 %v4322_v10  ;;  %v4407_v10 = vld [vmem:[%s6244_s2 + $0x348] ss:$16 sps:$4 sm:$0xff]   ;;  %v4412_v11 = vld [vmem:[%s6244_s2 + $0x56c] ss:$16 sps:$4 sm:$0xff]  }
  0x7f   :  { %1387 = vmatpush2.bf16.msra.mxu0 %v4323_v13  ;;  %v4410_v13 = vld [vmem:[%s6244_s2 + $0x568] ss:$16 sps:$4 sm:$0xff]  }
  0x80   :  { %1465 = vmatpush2.bf16.msra.mxu1 %v4320_v12  ;;  %1479 = vmatprep.subr.bf16.mxu0 %v4331_v17  ;;  %v4415_v12 = vld [vmem:[%s6244_s2 + $0x32c] ss:$16 sps:$4 sm:$0xff]  }
  0x81   :  { %1466 = vmatprep.subr.bf16.mxu1 %v4328_v14  ;;  %v4413_v14 = vld [vmem:[%s6244_s2 + $0x328] ss:$16 sps:$4 sm:$0xff]   ;;  %v4421_v17 = vld [vmem:[%s6244_s2 + $0x30c] ss:$16 sps:$4 sm:$0xff]  }
  0x82   :  { %1389 = vmatmul.mubr.bf16.vlgmr.msra.gmra.mxu0 %v5283_v20 }
  0x83   :  { %1480 = vmatpush1.bf16.msra.mxu0 %v4329_v21  ;;  %1511 = vmatprep.mubr.bf16.mxu0 %v5009_v52  ;;  %v4347_v52 = vld [vmem:[%s6244_s2 + $0x288] ss:$16 sps:$4 sm:$0xff]  }
  0x84   :  { %1467 = vmatpush2.bf16.msra.mxu1 %v4326_v18  ;;  %1481 = vmatprep.subr.bf16.mxu0 %v4337_v23  ;;  %v4416_v18 = vld [vmem:[%s6244_s2 + $0x548] ss:$16 sps:$4 sm:$0xff]  }
  0x85   :  { %1468 = vmatprep.subr.bf16.mxu1 %v4334_v22  ;;  %v4419_v21 = vld [vmem:[%s6244_s2 + $0x308] ss:$16 sps:$4 sm:$0xff]   ;;  %v4424_v22 = vld [vmem:[%s6244_s2 + $0x52c] ss:$16 sps:$4 sm:$0xff]  }
  0x86   :  { %v4431_v23 = vld [vmem:[%s6246_s4 + $0x78] sm:$0xff]  }
  0x87   :  { %1482 = vmatpush1.bf16.msra.mxu0 %v4335_v25  ;;  %v4432_v25 = vld [vmem:[%s6246_s4 + $0x38] sm:$0xff]  }
  0x88   :  { %1469 = vmatpush2.bf16.msra.mxu1 %v4332_v24  ;;  %1483 = vmatprep.subr.bf16.mxu0 %v4343_v27  ;;  %v4422_v24 = vld [vmem:[%s6244_s2 + $0x528] ss:$16 sps:$4 sm:$0xff]   ;;  %v4433_v27 = vld [vmem:[%s6246_s4 + $0x70] sm:$0xff]  }
  0x89   :  { %1520 = vmatprep.subr.bf16.mxu1 %v4340_v26  ;;  %v4427_v26 = vld [vmem:[%s6244_s2 + $0x50c] ss:$16 sps:$4 sm:$0xff]  }
  0x8b   :  { %1471 = vmatmul.mubr.bf16.vlgmr.msra.gmra.mxu1 %v5070_v8  ;;  %1484 = vmatpush1.bf16.msra.mxu0 %v4341_v29  ;;  %v4353_v8 = vld [vmem:[%s6244_s2 + $0x268] ss:$16 sps:$4 sm:$0xff]   ;;  %v4434_v29 = vld [vmem:[%s6246_s4 + $0x30] sm:$0xff]  }
  0x8c   :  { %1521 = vmatpush1.bf16.msra.mxu1 %v4338_v28  ;;  %1485 = vmatprep.subr.bf16.mxu0 %v4349_v31  ;;  %v4425_v28 = vld [vmem:[%s6244_s2 + $0x508] ss:$16 sps:$4 sm:$0xff]  }
  0x8d   :  { %1522 = vmatprep.subr.bf16.mxu1 %v4346_v30  ;;  %1552 = vmatprep.mubr.bf16.mxu1 %v5154_v36  ;;  %v4359_v36 = vld [vmem:[%s6244_s2 + $0x248] ss:$16 sps:$4 sm:$0xff]   ;;  %v4430_v30 = vld [vmem:[%s6244_s2 + $0x60c] ss:$16 sps:$4 sm:$0xff]  }
  0x8e   :  { %v4435_v31 = vld [vmem:[%s6246_s4 + $0x68] sm:$0xff]  }
  0x8f   :  { %1486 = vmatpush1.bf16.msra.mxu0 %v4347_v52  ;;  %v4437_v52 = vld [vmem:[%s6246_s4 + $0x60] sm:$0xff]  }
  0x90   :  { %1523 = vmatpush1.bf16.msra.mxu1 %v4344_v32  ;;  %1487 = vmatprep.subr.bf16.mxu0 %v4355_v34  ;;  %v4428_v32 = vld [vmem:[%s6244_s2 + $0x608] ss:$16 sps:$4 sm:$0xff]  }
  0x91   :  { %1524 = vmatprep.subr.bf16.mxu1 %v4352_v33  ;;  %v4438_v33 = vld [vmem:[%s6246_s4 + $0x20] sm:$0xff]   ;;  %v4439_v34 = vld [vmem:[%s6246_s4 + $0x58] sm:$0xff]  }
  0x93   :  { %1488 = vmatpush1.bf16.msra.mxu0 %v4353_v8  ;;  %v4447_v8 = vld [vmem:[%s6246_s4 + $0xb8] sm:$0xff]  }
  0x94   :  { %1525 = vmatpush1.bf16.msra.mxu1 %v4350_v35  ;;  %1489 = vmatprep.subr.bf16.mxu0 %v4361_v38  ;;  %v4441_v35 = vld [vmem:[%s6246_s4 + $0x50] sm:$0xff]  }
  0x95   :  { %1526 = vmatprep.subr.bf16.mxu1 %v4358_v37  ;;  %v4448_v37 = vld [vmem:[%s6246_s4 + $0xb0] sm:$0xff]  }
  0x96   :  { %v4442_v38 = vld [vmem:[%s6246_s4 + $0x10] sm:$0xff]  }
  0x97   :  { %1490 = vmatpush1.bf16.msra.mxu0 %v4359_v36  ;;  %v4449_v36 = vld [vmem:[%s6246_s4 + $0xa8] sm:$0xff]  }
  0x98   :  { %1527 = vmatpush1.bf16.msra.mxu1 %v4356_v39  ;;  %1491 = vmatprep.subr.bf16.mxu0 %v4367_v41  ;;  %v4443_v39 = vld [vmem:[%s6246_s4 + $0x48] sm:$0xff]   ;;  %v4446_v41 = vld [vmem:[%s6246_s4] sm:$0xff]  }
  0x99   :  { %1528 = vmatprep.subr.bf16.mxu1 %v4364_v40  ;;  %v4445_v40 = vld [vmem:[%s6246_s4 + $0x40] sm:$0xff]  }
  0x9b   :  { %1492 = vmatpush1.bf16.msra.mxu0 %v4365_v43 }
  0x9c   :  { %1529 = vmatpush1.bf16.msra.mxu1 %v4362_v42  ;;  %1493 = vmatprep.subr.bf16.mxu0 %v4373_v45 }
  0x9d   :  { %1530 = vmatprep.subr.bf16.mxu1 %v4370_v44 }
  0x9f   :  { %1494 = vmatpush1.bf16.msra.mxu0 %v4371_v47 }
  0xa0   :  { %1531 = vmatpush1.bf16.msra.mxu1 %v4368_v46  ;;  %1495 = vmatprep.subr.bf16.mxu0 %v4379_v49 }
  0xa1   :  { %1532 = vmatprep.subr.bf16.mxu1 %v4376_v48 }
  0xa3   :  { %1496 = vmatpush2.bf16.msra.mxu0 %v4377_v51 }
  0xa4   :  { %1533 = vmatpush1.bf16.msra.mxu1 %v4374_v50  ;;  %1497 = vmatprep.subr.bf16.mxu0 %v4385_v54 }
  0xa5   :  { %1534 = vmatprep.subr.bf16.mxu1 %v4382_v53 }
  0xa7   :  { %1498 = vmatpush2.bf16.msra.mxu0 %v4383_v56 }
  0xa8   :  { %1535 = vmatpush1.bf16.msra.mxu1 %v4380_v55  ;;  %1499 = vmatprep.subr.bf16.mxu0 %v4391_v58 }
  0xa9   :  { %1536 = vmatprep.subr.bf16.mxu1 %v4388_v57 }
  0xab   :  { %1500 = vmatpush2.bf16.msra.mxu0 %v4389_v60 }
  0xac   :  { %1537 = vmatpush2.bf16.msra.mxu1 %v4386_v59  ;;  %1501 = vmatprep.subr.bf16.mxu0 %v4397_v62 }
  0xad   :  { %1538 = vmatprep.subr.bf16.mxu1 %v4394_v61 }
  0xaf   :  { %1502 = vmatpush2.bf16.msra.mxu0 %v4395_v0 }
  0xb0   :  { %1539 = vmatpush2.bf16.msra.mxu1 %v4392_v63  ;;  %1503 = vmatprep.subr.bf16.mxu0 %v4403_v2 }
  0xb1   :  { %1540 = vmatprep.subr.bf16.mxu1 %v4400_v1 }
  0xb3   :  { %1504 = vmatpush2.bf16.msra.mxu0 %v4401_v4 }
  0xb4   :  { %1541 = vmatpush2.bf16.msra.mxu1 %v4398_v3  ;;  %1505 = vmatprep.subr.bf16.mxu0 %v4409_v6 }
  0xb5   :  { %1542 = vmatprep.subr.bf16.mxu1 %v4406_v5 }
  0xb7   :  { %1506 = vmatpush2.bf16.msra.mxu0 %v4407_v10 }
  0xb8   :  { %1543 = vmatpush2.bf16.msra.mxu1 %v4404_v7  ;;  %1507 = vmatprep.subr.bf16.mxu0 %v4415_v12 }
  0xb9   :  { %1544 = vmatprep.subr.bf16.mxu1 %v4412_v11 }
  0xbb   :  { %1508 = vmatpush2.bf16.msra.mxu0 %v4413_v14 }
  0xbc   :  { %1545 = vmatpush2.bf16.msra.mxu1 %v4410_v13  ;;  %1509 = vmatprep.subr.bf16.mxu0 %v4421_v17 }
  0xbd   :  { %1546 = vmatprep.subr.bf16.mxu1 %v4418_v15 }
  0xbf   :  { %1510 = vmatpush2.bf16.msra.mxu0 %v4419_v21 }
  0xc0   :  { %1547 = vmatpush2.bf16.msra.mxu1 %v4416_v18  ;;  %4089 = vmatprep.subr.bf16.mxu0 %v4431_v23 }
  0xc1   :  { %1548 = vmatprep.subr.bf16.mxu1 %v4424_v22 }
  0xc2   :  { %1512 = vmatmul.mubr.bf16.vlgmr.msra.gmra.mxu0 %v5072_v9  ;;  %v4436_v9 = vld [vmem:[%s6246_s4 + $0x28] sm:$0xff]  }
  0xc3   :  { %4090 = vmatpush3.bf16.msra.mxu0 %v4432_v25 }
  0xc4   :  { %1549 = vmatpush2.bf16.msra.mxu1 %v4422_v24  ;;  %4091 = vmatprep.subr.bf16.mxu0 %v4433_v27 }
  0xc5   :  { %1550 = vmatprep.subr.bf16.mxu1 %v4427_v26 }
  0xc7   :  { %4092 = vmatpush3.bf16.msra.mxu0 %v4434_v29 }
  0xc8   :  { %1551 = vmatpush2.bf16.msra.mxu1 %v4425_v28  ;;  %4093 = vmatprep.subr.bf16.mxu0 %v4435_v31 }
  0xc9   :  { %1575 = vmatprep.subr.bf16.mxu1 %v4430_v30 }
  0xcb   :  { %1553 = vmatmul.mubr.bf16.vlgmr.msra.gmra.mxu1 %v5283_v20  ;;  %4094 = vmatpush3.bf16.msra.mxu0 %v4436_v9  ;;  %v4440_v20 = vld [vmem:[%s6246_s4 + $0x18] sm:$0xff]  }
  0xcc   :  { %1576 = vmatpush1.bf16.msra.mxu1 %v4428_v32  ;;  %1593 = vmatprep.mubr.bf16.mxu1 %v4790_v16 }
  0xcd   :  { %1859 = vmatprep.subr.bf16.mxu1 %v4790_v16  ;;  %4095 = vmatprep.subr.bf16.mxu0 %v4437_v52 }
  0xcf   :  { %4096 = vmatpush3.bf16.msra.mxu0 %v4438_v33 }
  0xd0   :  { %4097 = vmatprep.subr.bf16.mxu0 %v4439_v34 }
  0xd3   :  { %3864 = vmatmul.mubr.msk.bf16.vlgmr.msra.gmra.mxu1 %vm1270_vm0, %v5101_v19  ;;  %4098 = vmatpush3.bf16.msra.mxu0 %v4440_v20  ;;  %v4444_v19 = vld [vmem:[%s6246_s4 + $0x8] sm:$0xff]  }
  0xd4   :  { %1860 = vmatpush1.bf16.msra.mxu1 %v4447_v8  ;;  %4099 = vmatprep.subr.bf16.mxu0 %v4441_v35 }
  0xd5   :  { %1861 = vmatprep.subr.bf16.mxu1 %v4790_v16 }
  0xd7   :  { %4100 = vmatpush3.bf16.msra.mxu0 %v4442_v38 }
  0xd8   :  { %1862 = vmatpush1.bf16.msra.mxu1 %v4448_v37  ;;  %4101 = vmatprep.subr.bf16.mxu0 %v4443_v39 }
  0xd9   :  { %1863 = vmatprep.subr.bf16.mxu1 %v4790_v16 }
  0xdb   :  { %4102 = vmatpush3.bf16.msra.mxu0 %v4444_v19 }
  0xdc   :  { %1864 = vmatpush1.bf16.msra.mxu1 %v4449_v36  ;;  %4103 = vmatprep.subr.bf16.mxu0 %v4445_v40 }
  0xdd   :  { %1865 = vmatprep.subr.bf16.mxu1 %v4790_v16 }
  0xde   :  { %18 = vsyncpa [#allocation5], 0  ;;  %v4450_v44 = vld [vmem:[%s6246_s4 + $0xa0] sm:$0xff]   ;;  %v4451_v47 = vld [vmem:[%s6246_s4 + $0x98] sm:$0xff]   ;;  %v254_v61 = vlaneseq  ;;  %vm1988_vm1 = vcmask 1041408   ;;  %vm3637_vm2 = vcmask 326656  }
  0xdf   :  { %4104 = vmatpush3.bf16.msra.mxu0 %v4446_v41  ;;  %v4452_v54 = vld [vmem:[%s6246_s4 + $0x90] sm:$0xff]   ;;  %v4453_v57 = vld [vmem:[%s6246_s4 + $0x88] sm:$0xff]   ;;  %v4454_v59 = vld [vmem:[%s6246_s4 + $0x80] sm:$0xff]   ;;  %s4791_s13 = smov 108   ;;  %vm1984_vm3 = vcmask 162816  }
  0xe0   :  { %1866 = vmatpush1.bf16.msra.mxu1 %v4450_v44  ;;  %v4455_v60 = vld [vmem:[%s6246_s4 + $0xc0] sm:$0xff]   ;;  %v255_v62 = vshrl.u32 %v254_v61, 7 }
  0xe1   :  { %1867 = vmatprep.subr.bf16.mxu1 %v4790_v16  ;;  %v251_v63 = vld [vmem:[%s6245_s3] sm:$0xf] }
  0xe2   :  { %v252_v0 = vunpack.c.l.bf16 %v251_v63  ;;  %v5582_v1 = vsub.s32 0, %v255_v62  ;;  %v5584_v2 = vsub.s32 2, %v255_v62  ;;  %v5590_v32 = vsub.s32 4, %v255_v62 }
  0xe3   :  { %v5592_v52 = vsub.s32 6, %v255_v62 }
  0xe4   :  { %1868 = vmatpush1.bf16.msra.mxu1 %v4451_v47  ;;  %v257_v3 = vrot.slane %v252_v0, %v5582_v1  ;;  %v261_v4 = vrot.slane %v252_v0, %v5584_v2  ;;  %v265_v34 = vrot.slane %v252_v0, %v5590_v32 }
  0xe5   :  { %1869 = vmatprep.subr.bf16.mxu1 %v4790_v16  ;;  %v269_v35 = vrot.slane %v252_v0, %v5592_v52 }
  0xe6   :  { %v277_v5 = vrot.slane %v257_v3, %v5582_v1  ;;  %v281_v6 = vrot.slane %v261_v4, %v5582_v1  ;;  %v285_v37 = vrot.slane %v265_v34, %v5582_v1  ;;  %v1660_v3 = vld [vmem:[%s6247_s5] sm:$0x1]  ;;  %v4480_v34 = vld [vmem:[%s6250_s8 + $0xac] ss:$28 sps:$4 sm:$0xff]  }
  0xe7   :  { %v289_v39 = vrot.slane %v269_v35, %v5582_v1  ;;  %v1661_v4 = vunpack.c.l.bf16 %v1660_v3  ;;  %v4483_v35 = vld [vmem:[%s6250_s8 + $0x74] ss:$28 sps:$4 sm:$0xff]   ;;  %v4510_v3 = vld [vmem:[%s6250_s8 + $0x49c] ss:$28 sps:$4 sm:$0xff]  }
  0xe8   :  { %1870 = vmatpush1.bf16.msra.mxu1 %v4452_v54 }
  0xe9   :  { %1871 = vmatprep.subr.bf16.mxu1 %v4790_v16 }
  0xec   :  { %1872 = vmatpush1.bf16.msra.mxu1 %v4453_v57 }
  0xed   :  { %1873 = vmatprep.subr.bf16.mxu1 %v4790_v16 }
  0xf0   :  { %1874 = vmatpush1.bf16.msra.mxu1 %v4454_v59 }
  0xf1   :  { %1889 = vmatprep.subr.bf16.mxu1 %v4790_v16 }
  0xf4   :  { %1890 = vmatpush2.bf16.msra.mxu1 %v4455_v60 }
 0x102   :  { %v1308_v42 = vpop.f32.mrf.mxu0 }
 0x103   :  { %v1349_v43 = vpop.f32.mrf.mxu1  ;;  %v1309_v7 = vadd.f32 %v1308_v42, %v277_v5  ;;  %v1665_v5 = vrot.slane %v1661_v4, %v5582_v1  ;;  %v4508_v4 = vld [vmem:[%s6250_s8 + $0x498] ss:$28 sps:$4 sm:$0xff]  }
 0x104   :  { %v1310_v45 = vpop.f32.mrf.mxu0 }
 0x105   :  { %v1351_v46 = vpop.f32.mrf.mxu1  ;;  %v1311_v10 = vadd.f32 %v1310_v45, %v281_v6  ;;  %v1350_v11 = vadd.f32 %v1349_v43, %v1309_v7 }
 0x106   :  { %v1312_v49 = vpop.f32.mrf.mxu0 }
 0x107   :  { %v1353_v48 = vpop.f32.mrf.mxu1  ;;  %v1352_v13 = vadd.f32 %v1351_v46, %v1311_v10 }
 0x108   :  { %v1313_v51 = vpop.f32.mrf.mxu0 }
 0x109   :  { %v1354_v50 = vpop.f32.mrf.mxu1 }
 0x10b   :  { %v1431_v53 = vpop.f32.mrf.mxu1 }
 0x10d   :  { %v1433_v55 = vpop.f32.mrf.mxu1 }
 0x10f   :  { %v1435_v56 = vpop.f32.mrf.mxu1 }
 0x111   :  { %v1436_v58 = vpop.f32.mrf.mxu1 }
 0x112   :  { %v1913_v58 = vld [vmem:[%s6248_s6 + $0x20] sm:$0x33] }
 0x113   :  { %v3896_v59 = vcombine.high %v1913_v58, %v1913_v58 }
 0x115   :  { %3899 = vmatprep.subr.msk.bf16.mxu1 %vm1988_vm1, %v3896_v59  ;;  %v4465_v59 = vld [vmem:[%s6248_s6 + $0xc] ss:$16 sps:$4 sm:$0xff]  }
 0x142   :  { %v1390_v12 = vpop.f32.mrf.mxu0 }
 0x143   :  { %v1391_v14 = vadd.f32 %v1390_v12, %v1350_v11 }
 0x144   :  { %v1392_v15 = vpop.f32.mrf.mxu0 }
 0x145   :  { %v1432_v17 = vadd.f32 %v1431_v53, %v1391_v14  ;;  %v1393_v18 = vadd.f32 %v1392_v15, %v1352_v13  ;;  %v3895_v14 = vcombine.low %v1913_v58, %v1913_v58 }
 0x146   :  { %v1394_v21 = vpop.f32.mrf.mxu0 }
 0x147   :  { %v1434_v22 = vadd.f32 %v1433_v55, %v1393_v18  ;;  %v1602_v23 = vmax.f32 %v1432_v17, 0.0  ;;  %v1990_v18 = vsel %vm1988_vm1, %v3895_v14, 0  ;;  %v4460_v21 = vld [vmem:[%s6248_s6 + $0x4] ss:$16 sps:$4 sm:$0xff]   ;;  %v4526_v14 = vld [vmem:[%s6250_s8 + $0x3f0] ss:$28 sps:$4 sm:$0xff]  }
 0x148   :  { %v1395_v24 = vpop.f32.mrf.mxu0 }
 0x149   :  { %v1603_v25 = vmax.f32 %v1434_v22, 0.0  ;;  %v1606_v28 = vpack.c.bf16 %v1602_v23, %v1602_v23  ;;  %v4458_v22 = vld [vmem:[%s6248_s6] ss:$16 sps:$4 sm:$0xff]   ;;  %v5622_v23 = vld [vmem:[%s6248_s6 + $0x28] sm:$0x33] }
 0x14a   :  { %v3898_v24 = vcombine.high %v5622_v23, %v5622_v23 }
 0x14b   :  { %v1472_v26 = vpop.f32.mrf.mxu1  ;;  %v1607_v27 = vpack.c.bf16 %v1603_v25, %v1603_v25 }
 0x14c   :  { %v1473_v19 = vadd.f32 %v1472_v26, %v285_v37  ;;  %v4466_v26 = vld [vmem:[%s6250_s8 + $0x188] ss:$28 sps:$4 sm:$0xff]   ;;  %v4486_v37 = vld [vmem:[%s6250_s8 + $0x3c] ss:$28 sps:$4 sm:$0xff]  }
 0x14d   :  { %v1474_v29 = vpop.f32.mrf.mxu1  ;;  %1851 = vmatprep.mubr.bf16.mxu0 %v1607_v27  ;;  %v4468_v27 = vld [vmem:[%s6250_s8 + $0x18c] ss:$28 sps:$4 sm:$0xff]  }
 0x14e   :  { %1852 = vmatmul.mubr.bf16.vlgmr.msra.gmra.mxu0 %v1606_v28  ;;  %v1475_v41 = vadd.f32 %v1474_v29, %v289_v39  ;;  %v4471_v28 = vld [vmem:[%s6250_s8 + $0x154] ss:$28 sps:$4 sm:$0xff]   ;;  %3262 = vmatprep.subr.bf16.mxu0 %v4468_v27  ;;  %v4489_v39 = vld [vmem:[%s6250_s8 + $0x4] ss:$28 sps:$4 sm:$0xff]  }
 0x14f   :  { %v1476_v30 = vpop.f32.mrf.mxu1  ;;  %3263 = vmatpush1.bf16.msra.mxu0 %v4466_v26  ;;  %v4469_v29 = vld [vmem:[%s6250_s8 + $0x150] ss:$28 sps:$4 sm:$0xff]   ;;  %v4541_v26 = vld [vmem:[%s6250_s8 + $0x540] ss:$28 sps:$4 sm:$0xff]  }
 0x150   :  { %3264 = vmatprep.subr.bf16.mxu0 %v4471_v28  ;;  %v4474_v30 = vld [vmem:[%s6250_s8 + $0x11c] ss:$28 sps:$4 sm:$0xff]   ;;  %v4549_v27 = vld [vmem:[%s6250_s8 + $0x194] ss:$28 sps:$4 sm:$0xff]   ;;  %v1915_v28 = vld [vmem:[%s6249_s7] sm:$0xf] }
 0x151   :  { %v1477_v31 = vpop.f32.mrf.mxu1 }
 0x152   :  { %v4472_v31 = vld [vmem:[%s6250_s8 + $0x118] ss:$28 sps:$4 sm:$0xff]  }
 0x153   :  { %3265 = vmatpush1.bf16.msra.mxu0 %v4469_v29  ;;  %v1916_v29 = vunpack.c.l.bf16 %v1915_v28  ;;  %v4586_v28 = vld [vmem:[%s6250_s8 + $0x548] ss:$28 sps:$4 sm:$0xff]  }
 0x154   :  { %3266 = vmatprep.subr.bf16.mxu0 %v4474_v30 }
 0x155   :  { %v1921_v30 = vrot.slane %v1916_v29, %v5582_v1 }
 0x157   :  { %3267 = vmatpush1.bf16.msra.mxu0 %v4472_v31  ;;  %v1925_v31 = vrot.slane %v1916_v29, %v5584_v2 }
 0x182   :  { %v1513_v9 = vpop.f32.mrf.mxu0 }
 0x183   :  { %v1514_v42 = vadd.f32 %v1513_v9, %v1473_v19  ;;  %v4477_v9 = vld [vmem:[%s6250_s8 + $0xe4] ss:$28 sps:$4 sm:$0xff]   ;;  %v4492_v19 = vld [vmem:[%s6250_s8 + $0x34c] ss:$28 sps:$4 sm:$0xff]  }
 0x184   :  { %v1515_v33 = vpop.f32.mrf.mxu0  ;;  %3268 = vmatprep.subr.bf16.mxu0 %v4477_v9  ;;  %v1941_v9 = vrot.slane %v1921_v30, %v5582_v1  ;;  %v4594_v30 = vld [vmem:[%s6250_s8 + $0x19c] ss:$28 sps:$4 sm:$0xff]  }
 0x185   :  { %v1516_v44 = vadd.f32 %v1515_v33, %v1475_v41  ;;  %v4475_v33 = vld [vmem:[%s6250_s8 + $0xe0] ss:$28 sps:$4 sm:$0xff]   ;;  %v4495_v41 = vld [vmem:[%s6250_s8 + $0x314] ss:$28 sps:$4 sm:$0xff]  }
 0x186   :  { %v1517_v20 = vpop.f32.mrf.mxu0  ;;  %3269 = vmatpush1.bf16.msra.mxu0 %v4475_v33  ;;  %v1945_v33 = vrot.slane %v1925_v31, %v5582_v1  ;;  %v4589_v31 = vld [vmem:[%s6250_s8 + $0x8] ss:$28 sps:$4 sm:$0xff]  }
 0x187   :  { %v4478_v20 = vld [vmem:[%s6250_s8 + $0xa8] ss:$28 sps:$4 sm:$0xff]   ;;  %3270 = vmatprep.subr.bf16.mxu0 %v4480_v34 }
 0x188   :  { %v1518_v8 = vpop.f32.mrf.mxu0 }
 0x189   :  { %v4481_v8 = vld [vmem:[%s6250_s8 + $0x70] ss:$28 sps:$4 sm:$0xff]  }
 0x18a   :  { %3271 = vmatpush1.bf16.msra.mxu0 %v4478_v20 }
 0x18b   :  { %v1554_v38 = vpop.f32.mrf.mxu1  ;;  %3272 = vmatprep.subr.bf16.mxu0 %v4483_v35  ;;  %v1929_v35 = vrot.slane %v1916_v29, %v5590_v32 }
 0x18c   :  { %v1555_v45 = vadd.f32 %v1554_v38, %v1514_v42  ;;  %v4484_v38 = vld [vmem:[%s6250_s8 + $0x38] ss:$28 sps:$4 sm:$0xff]   ;;  %v4493_v42 = vld [vmem:[%s6250_s8 + $0x310] ss:$28 sps:$4 sm:$0xff]  }
 0x18d   :  { %v1556_v36 = vpop.f32.mrf.mxu1 }
 0x18e   :  { %v1557_v47 = vadd.f32 %v1556_v36, %v1516_v44  ;;  %3273 = vmatpush1.bf16.msra.mxu0 %v4481_v8  ;;  %v4487_v36 = vld [vmem:[%s6250_s8] ss:$28 sps:$4 sm:$0xff]   ;;  %v4499_v44 = vld [vmem:[%s6250_s8 + $0x2d8] ss:$28 sps:$4 sm:$0xff]  }
 0x18f   :  { %v1558_v40 = vpop.f32.mrf.mxu1  ;;  %3274 = vmatprep.subr.bf16.mxu0 %v4486_v37 }
 0x190   :  { %v4490_v40 = vld [vmem:[%s6250_s8 + $0x348] ss:$28 sps:$4 sm:$0xff]  }
 0x191   :  { %v1559_v43 = vpop.f32.mrf.mxu1 }
 0x192   :  { %3275 = vmatpush1.bf16.msra.mxu0 %v4484_v38  ;;  %v4501_v43 = vld [vmem:[%s6250_s8 + $0x2dc] ss:$28 sps:$4 sm:$0xff]   ;;  %v1933_v38 = vrot.slane %v1916_v29, %v5592_v52  ;;  %v4591_v29 = vld [vmem:[%s6250_s8 + $0xc] ss:$28 sps:$4 sm:$0xff]  }
 0x193   :  { %v1595_v46 = vpop.f32.mrf.mxu1  ;;  %3276 = vmatprep.subr.bf16.mxu0 %v4489_v39 }
 0x194   :  { %v1596_v48 = vadd.f32 %v1595_v46, %v1555_v45  ;;  %v4507_v45 = vld [vmem:[%s6250_s8 + $0x2a4] ss:$28 sps:$4 sm:$0xff]  }
 0x195   :  { %v1597_v49 = vpop.f32.mrf.mxu1  ;;  %v4505_v46 = vld [vmem:[%s6250_s8 + $0x2a0] ss:$28 sps:$4 sm:$0xff]  }
 0x196   :  { %v1598_v50 = vadd.f32 %v1597_v49, %v1557_v47  ;;  %v1604_v51 = vmax.f32 %v1596_v48, 0.0  ;;  %3277 = vmatpush1.bf16.msra.mxu0 %v4487_v36  ;;  %v4513_v47 = vld [vmem:[%s6250_s8 + $0x26c] ss:$28 sps:$4 sm:$0xff]   ;;  %v4519_v49 = vld [vmem:[%s6250_s8 + $0x234] ss:$28 sps:$4 sm:$0xff]  }
 0x197   :  { %v1599_v53 = vpop.f32.mrf.mxu1  ;;  %3278 = vmatprep.subr.bf16.mxu0 %v4492_v19  ;;  %v4511_v48 = vld [vmem:[%s6250_s8 + $0x268] ss:$28 sps:$4 sm:$0xff]  }
 0x198   :  { %v1605_v54 = vmax.f32 %v1598_v50, 0.0  ;;  %v1608_v57 = vpack.c.bf16 %v1604_v51, %v1604_v51  ;;  %v4517_v50 = vld [vmem:[%s6250_s8 + $0x230] ss:$28 sps:$4 sm:$0xff]   ;;  %v47_v51 = vld [vmem:[%s6243_s1] sm:$0xff] }
 0x199   :  { %v1600_v55 = vpop.f32.mrf.mxu1 }
 0x19a   :  { %v1609_v56 = vpack.c.bf16 %v1605_v54, %v1605_v54  ;;  %3279 = vmatpush2.bf16.msra.mxu0 %v4490_v40  ;;  %v3897_v55 = vcombine.low %v5622_v23, %v5622_v23  ;;  %v4540_v23 = vld [vmem:[%s6250_s8 + $0x514] ss:$28 sps:$4 sm:$0xff]   ;;  %v1949_v40 = vrot.slane %v1929_v35, %v5582_v1  ;;  %v4598_v35 = vld [vmem:[%s6250_s8 + $0x160] ss:$28 sps:$4 sm:$0xff]  }
 0x19b   :  { %3280 = vmatprep.subr.bf16.mxu0 %v4495_v41 }
 0x19c   :  { %3890 = vmatprep.mubr.msk.bf16.mxu1 %vm1270_vm0, %v1609_v56  ;;  %v1996_v58 = vsel %vm1988_vm1, %v3897_v55, 0  ;;  %v4552_v55 = vld [vmem:[%s6250_s8 + $0x4a4] ss:$28 sps:$4 sm:$0xff]  }
 0x19d   :  { %1892 = vmatmul.mubr.bf16.vlgmr.msra.gmra.mxu1 %v1608_v57 }
 0x19e   :  { %2033 = vmatprep.mubr.bf16.mxu1 %v4790_v16  ;;  %2014 = vmatpush1.bf16.msra.mxu1 %v1990_v18  ;;  %v4529_v18 = vld [vmem:[%s6250_s8 + $0x1c0] ss:$28 sps:$4 sm:$0xff]  }
 0x19f   :  { %2015 = vmatprep.subr.bf16.mxu1 %v4460_v21  ;;  %3281 = vmatpush2.bf16.msra.mxu0 %v4493_v42  ;;  %v4532_v21 = vld [vmem:[%s6250_s8 + $0x3b8] ss:$28 sps:$4 sm:$0xff]  }
 0x1a0   :  { %3282 = vmatprep.subr.bf16.mxu0 %v4501_v43  ;;  %v4538_v43 = vld [vmem:[%s6250_s8 + $0x510] ss:$28 sps:$4 sm:$0xff]  }
 0x1a2   :  { %2016 = vmatpush1.bf16.msra.mxu1 %v4458_v22  ;;  %v4537_v22 = vld [vmem:[%s6250_s8 + $0x384] ss:$28 sps:$4 sm:$0xff]  }
 0x1a3   :  { %3901 = vmatprep.subr.msk.bf16.mxu1 %vm1988_vm1, %v3898_v24  ;;  %3283 = vmatpush2.bf16.msra.mxu0 %v4499_v44  ;;  %v4535_v24 = vld [vmem:[%s6250_s8 + $0x380] ss:$28 sps:$4 sm:$0xff]   ;;  %v1953_v44 = vrot.slane %v1933_v38, %v5582_v1  ;;  %v4601_v38 = vld [vmem:[%s6250_s8 + $0x318] ss:$28 sps:$4 sm:$0xff]  }
 0x1a4   :  { %3284 = vmatprep.subr.bf16.mxu0 %v4507_v45 }
 0x1a7   :  { %3285 = vmatpush2.bf16.msra.mxu0 %v4505_v46 }
 0x1a8   :  { %3286 = vmatprep.subr.bf16.mxu0 %v4513_v47  ;;  %v4546_v47 = vld [vmem:[%s6250_s8 + $0x4dc] ss:$28 sps:$4 sm:$0xff]  }
 0x1ab   :  { %3287 = vmatpush2.bf16.msra.mxu0 %v4511_v48 }
 0x1ac   :  { %3288 = vmatprep.subr.bf16.mxu0 %v4519_v49 }
 0x1af   :  { %3289 = vmatpush2.bf16.msra.mxu0 %v4517_v50 }
 0x20e   :  { %v4105_v60 = vpop.f32.mrf.mxu0 }
 0x210   :  { %v4106_v61 = vpop.f32.mrf.mxu0 }
 0x211   :  { %v4107_v62 = vadd.f32 %v4106_v61, %v4105_v60  ;;  %v4463_v60 = vld [vmem:[%s6248_s6 + $0x8] ss:$16 sps:$4 sm:$0xff]  }
 0x212   :  { %v4108_v63 = vpop.f32.mrf.mxu0  ;;  %v4498_v61 = vld [vmem:[%s6250_s8 + $0x50c] ss:$28 sps:$4 sm:$0xff]  }
 0x213   :  { %v1854_v6 = vadd.f32 %v4107_v62, %v1665_v5  ;;  %v4496_v62 = vld [vmem:[%s6250_s8 + $0x508] ss:$28 sps:$4 sm:$0xff]   ;;  %v4504_v63 = vld [vmem:[%s6250_s8 + $0x4d4] ss:$28 sps:$4 sm:$0xff]  }
 0x214   :  { %v4109_v0 = vpop.f32.mrf.mxu0  ;;  %v4516_v5 = vld [vmem:[%s6250_s8 + $0x464] ss:$28 sps:$4 sm:$0xff]  }
 0x215   :  { %v4502_v0 = vld [vmem:[%s6250_s8 + $0x4d0] ss:$28 sps:$4 sm:$0xff]  }
 0x25d   :  { %v1893_v7 = vpop.f32.mrf.mxu1 }
 0x25e   :  { %v5608_v10 = vadd.f32 %v1893_v7, %v1854_v6  ;;  %v4514_v6 = vld [vmem:[%s6250_s8 + $0x460] ss:$28 sps:$4 sm:$0xff]   ;;  %v4522_v7 = vld [vmem:[%s6250_s8 + $0x42c] ss:$28 sps:$4 sm:$0xff]  }
 0x25f   :  { %v1895_v11 = vpop.f32.mrf.mxu1 }
 0x260   :  { %v1899_v12 = vmul.f32 0.5, %v5608_v10  ;;  %3638 = vst.msk [vmem:[#allocation4] sm:$0xff] %vm3637_vm2, %v5608_v10  ;;  %v4525_v11 = vld [vmem:[%s6250_s8 + $0x1fc] ss:$28 sps:$4 sm:$0xff]  }
 0x261   :  { %v1896_v13 = vpop.f32.mrf.mxu1  ;;  %3290 = vmatprep.subr.bf16.mxu0 %v4525_v11  ;;  %v4570_v11 = vld [vmem:[%s6250_s8 + $0x3fc] ss:$28 sps:$4 sm:$0xff]  }
 0x262   :  { %v1900_v15 = vmul.f32 1.442695, %v1899_v12  ;;  %v4528_v12 = vld [vmem:[%s6250_s8 + $0x3f4] ss:$28 sps:$4 sm:$0xff]  }
 0x263   :  { %v1897_v17 = vpop.f32.mrf.mxu1  ;;  %v4523_v13 = vld [vmem:[%s6250_s8 + $0x1f8] ss:$28 sps:$4 sm:$0xff]  }
 0x264   :  { %4716 = vpow2.f32 %v1900_v15  ;;  %3291 = vmatpush2.bf16.msra.mxu0 %v4523_v13  ;;  %v4531_v15 = vld [vmem:[%s6250_s8 + $0x1c4] ss:$28 sps:$4 sm:$0xff]   ;;  %v4534_v17 = vld [vmem:[%s6250_s8 + $0x3bc] ss:$28 sps:$4 sm:$0xff]  }
 0x265   :  { %3292 = vmatprep.subr.bf16.mxu0 %v4531_v15  ;;  %v4568_v13 = vld [vmem:[%s6250_s8 + $0x3f8] ss:$28 sps:$4 sm:$0xff]   ;;  %v4576_v15 = vld [vmem:[%s6250_s8 + $0x3c4] ss:$28 sps:$4 sm:$0xff]  }
 0x268   :  { %3293 = vmatpush2.bf16.msra.mxu0 %v4529_v18  ;;  %v4574_v18 = vld [vmem:[%s6250_s8 + $0x3c0] ss:$28 sps:$4 sm:$0xff]  }
 0x269   :  { %3385 = vmatprep.subr.bf16.mxu0 %v4540_v23  ;;  %v4577_v23 = vld [vmem:[%s6250_s8 + $0x78] ss:$28 sps:$4 sm:$0xff]  }
 0x271   :  { %v4717_v25 = vpop.eup %4716 }
 0x272   :  { %1903 = vrot.lane.b32.xlu0 %v4717_v25, %s4791_s13  ;;  %v4543_v25 = vld [vmem:[%s6250_s8 + $0x544] ss:$28 sps:$4 sm:$0xff]  }
 0x2e4   :  { %v1904_v53 = vpop.permute.xlu0 %1903 }
 0x2e5   :  { %v1906_v54 = vmul.f32 %v1904_v53, %v47_v51  ;;  %v4544_v51 = vld [vmem:[%s6250_s8 + $0x4d8] ss:$28 sps:$4 sm:$0xff]  }
 0x2e7   :  { %v1907_v56 = vadd.f32 %v1906_v54, %v5608_v10  ;;  %v4520_v10 = vld [vmem:[%s6250_s8 + $0x428] ss:$28 sps:$4 sm:$0xff]  }
 0x2e9   :  { %v1908_v57 = vpack.c.bf16 %v1907_v56, %v1907_v56 }
 0x2eb   :  { %3900 = vmatmul.mubr.msk.bf16.vlgmr.msra.gmra.mxu1 %vm1984_vm3, %v1908_v57 }
 0x2ec   :  { %2055 = vmatpush1.bf16.msra.mxu1 %v1996_v58  ;;  %2074 = vmatprep.mubr.bf16.mxu1 %v4790_v16 }
 0x2ed   :  { %2056 = vmatprep.subr.bf16.mxu1 %v4465_v59  ;;  %v4547_v59 = vld [vmem:[%s6250_s8 + $0x190] ss:$28 sps:$4 sm:$0xff]  }
 0x2f0   :  { %2057 = vmatpush1.bf16.msra.mxu1 %v4463_v60  ;;  %v4550_v60 = vld [vmem:[%s6250_s8 + $0x4a0] ss:$28 sps:$4 sm:$0xff]  }
 0x2f1   :  { %3303 = vmatprep.subr.bf16.mxu1 %v4498_v61 }
 0x2f3   :  { %3902 = vmatmul.mubr.msk.bf16.vlgmr.msra.gmra.mxu1 %vm1984_vm3, %v1908_v57 }
 0x2f4   :  { %3304 = vmatpush1.bf16.msra.mxu1 %v4496_v62  ;;  %v4555_v62 = vld [vmem:[%s6250_s8 + $0x15c] ss:$28 sps:$4 sm:$0xff]  }
 0x2f5   :  { %3305 = vmatprep.subr.bf16.mxu1 %v4504_v63  ;;  %v4558_v63 = vld [vmem:[%s6250_s8 + $0x46c] ss:$28 sps:$4 sm:$0xff]  }
 0x2f8   :  { %3306 = vmatpush1.bf16.msra.mxu1 %v4502_v0  ;;  %v4553_v0 = vld [vmem:[%s6250_s8 + $0x158] ss:$28 sps:$4 sm:$0xff]  }
 0x2f9   :  { %3307 = vmatprep.subr.bf16.mxu1 %v4510_v3  ;;  %v4556_v3 = vld [vmem:[%s6250_s8 + $0x468] ss:$28 sps:$4 sm:$0xff]  }
 0x2fc   :  { %3308 = vmatpush1.bf16.msra.mxu1 %v4508_v4  ;;  %v4561_v4 = vld [vmem:[%s6250_s8 + $0x124] ss:$28 sps:$4 sm:$0xff]  }
 0x2fd   :  { %3309 = vmatprep.subr.bf16.mxu1 %v4516_v5  ;;  %v4564_v5 = vld [vmem:[%s6250_s8 + $0x434] ss:$28 sps:$4 sm:$0xff]  }
 0x300   :  { %3310 = vmatpush1.bf16.msra.mxu1 %v4514_v6  ;;  %v4559_v6 = vld [vmem:[%s6250_s8 + $0x120] ss:$28 sps:$4 sm:$0xff]  }
 0x301   :  { %3311 = vmatprep.subr.bf16.mxu1 %v4522_v7  ;;  %v4562_v7 = vld [vmem:[%s6250_s8 + $0x430] ss:$28 sps:$4 sm:$0xff]  }
 0x304   :  { %3312 = vmatpush1.bf16.msra.mxu1 %v4520_v10  ;;  %v4567_v10 = vld [vmem:[%s6250_s8 + $0xec] ss:$28 sps:$4 sm:$0xff]  }
 0x305   :  { %3313 = vmatprep.subr.bf16.mxu1 %v4528_v12  ;;  %v4565_v12 = vld [vmem:[%s6250_s8 + $0xe8] ss:$28 sps:$4 sm:$0xff]  }
 0x308   :  { %3314 = vmatpush1.bf16.msra.mxu1 %v4526_v14  ;;  %v4573_v14 = vld [vmem:[%s6250_s8 + $0xb4] ss:$28 sps:$4 sm:$0xff]  }
 0x309   :  { %3315 = vmatprep.subr.bf16.mxu1 %v4534_v17  ;;  %v4571_v17 = vld [vmem:[%s6250_s8 + $0xb0] ss:$28 sps:$4 sm:$0xff]  }
 0x30c   :  { %3316 = vmatpush1.bf16.msra.mxu1 %v4532_v21  ;;  %v4579_v21 = vld [vmem:[%s6250_s8 + $0x7c] ss:$28 sps:$4 sm:$0xff]  }
 0x30d   :  { %3317 = vmatprep.subr.bf16.mxu1 %v4537_v22  ;;  %v4582_v22 = vld [vmem:[%s6250_s8 + $0x38c] ss:$28 sps:$4 sm:$0xff]  }
 0x310   :  { %3318 = vmatpush1.bf16.msra.mxu1 %v4535_v24  ;;  %v4580_v24 = vld [vmem:[%s6250_s8 + $0x388] ss:$28 sps:$4 sm:$0xff]  }
 0x311   :  { %3333 = vmatprep.subr.bf16.mxu1 %v4543_v25  ;;  %v4585_v25 = vld [vmem:[%s6250_s8 + $0x44] ss:$28 sps:$4 sm:$0xff]  }
 0x314   :  { %3334 = vmatpush2.bf16.msra.mxu1 %v4541_v26  ;;  %v4588_v26 = vld [vmem:[%s6250_s8 + $0x54c] ss:$28 sps:$4 sm:$0xff]  }
 0x315   :  { %3344 = vmatprep.subr.bf16.mxu1 %v4549_v27  ;;  %v4583_v27 = vld [vmem:[%s6250_s8 + $0x40] ss:$28 sps:$4 sm:$0xff]  }
 0x3ab   :  { %v2035_v34 = vpop.f32.mrf.mxu1 }
 0x3ac   :  { %v2036_v20 = vadd.f32 %v2035_v34, %v1941_v9  ;;  %v4592_v9 = vld [vmem:[%s6250_s8 + $0x198] ss:$28 sps:$4 sm:$0xff]   ;;  %v4600_v34 = vld [vmem:[%s6250_s8 + $0x164] ss:$28 sps:$4 sm:$0xff]  }
 0x3ad   :  { %v2037_v8 = vpop.f32.mrf.mxu1 }
 0x3ae   :  { %v2038_v37 = vadd.f32 %v2037_v8, %v1945_v33  ;;  %v2083_v39 = vmax.f32 %v2036_v20, 0.0  ;;  %v4597_v33 = vld [vmem:[%s6250_s8 + $0x354] ss:$28 sps:$4 sm:$0xff]   ;;  %v4603_v8 = vld [vmem:[%s6250_s8 + $0x31c] ss:$28 sps:$4 sm:$0xff]  }
 0x3af   :  { %v2039_v36 = vpop.f32.mrf.mxu1  ;;  %v4595_v20 = vld [vmem:[%s6250_s8 + $0x350] ss:$28 sps:$4 sm:$0xff]  }
 0x3b0   :  { %v2084_v19 = vmax.f32 %v2038_v37, 0.0  ;;  %v5813_v45 = vpack.c.bf16 %v2083_v39, %v2083_v39  ;;  %v4606_v37 = vld [vmem:[%s6250_s8 + $0x12c] ss:$28 sps:$4 sm:$0xff]   ;;  %v4609_v36 = vld [vmem:[%s6250_s8 + $0x2e4] ss:$28 sps:$4 sm:$0xff]  }
 0x3b1   :  { %v2040_v41 = vpop.f32.mrf.mxu1  ;;  %v4604_v39 = vld [vmem:[%s6250_s8 + $0x128] ss:$28 sps:$4 sm:$0xff]  }
 0x3b2   :  { %v5807_v42 = vpack.c.bf16 %v2084_v19, %v2084_v19  ;;  %v4612_v19 = vld [vmem:[%s6250_s8 + $0xf4] ss:$28 sps:$4 sm:$0xff]  }
 0x3b3   :  { %v2076_v46 = vpop.f32.mrf.mxu1  ;;  %v4610_v41 = vld [vmem:[%s6250_s8 + $0xf0] ss:$28 sps:$4 sm:$0xff]  }
 0x3b4   :  { %v2077_v48 = vadd.f32 %v2076_v46, %v1949_v40  ;;  %3294 = vmatprep.mubr.bf16.mxu0 %v5807_v42  ;;  %v4607_v40 = vld [vmem:[%s6250_s8 + $0x2e0] ss:$28 sps:$4 sm:$0xff]   ;;  %v4613_v46 = vld [vmem:[%s6250_s8 + $0x2a8] ss:$28 sps:$4 sm:$0xff]  }
 0x3b5   :  { %v2078_v49 = vpop.f32.mrf.mxu1  ;;  %3295 = vmatmul.mubr.bf16.vlgmr.msra.gmra.mxu0 %v5813_v45 }
 0x3b6   :  { %v2079_v50 = vadd.f32 %v2078_v49, %v1953_v44  ;;  %3386 = vmatpush1.bf16.msra.mxu0 %v4538_v43  ;;  %v2085_v53 = vmax.f32 %v2077_v48, 0.0  ;;  %v4615_v43 = vld [vmem:[%s6250_s8 + $0x2ac] ss:$28 sps:$4 sm:$0xff]   ;;  %v4618_v44 = vld [vmem:[%s6250_s8 + $0xbc] ss:$28 sps:$4 sm:$0xff]  }
 0x3b7   :  { %v2080_v54 = vpop.f32.mrf.mxu1  ;;  %3387 = vmatprep.subr.bf16.mxu0 %v4546_v47  ;;  %v4616_v47 = vld [vmem:[%s6250_s8 + $0xb8] ss:$28 sps:$4 sm:$0xff]   ;;  %v4624_v49 = vld [vmem:[%s6250_s8 + $0x84] ss:$28 sps:$4 sm:$0xff]  }
 0x3b8   :  { %v2086_v56 = vmax.f32 %v2079_v50, 0.0  ;;  %v5834_v61 = vpack.c.bf16 %v2085_v53, %v2085_v53  ;;  %v4621_v48 = vld [vmem:[%s6250_s8 + $0x274] ss:$28 sps:$4 sm:$0xff]   ;;  %v4627_v53 = vld [vmem:[%s6250_s8 + $0x23c] ss:$28 sps:$4 sm:$0xff]  }
 0x3b9   :  { %v2081_v57 = vpop.f32.mrf.mxu1  ;;  %v4619_v50 = vld [vmem:[%s6250_s8 + $0x270] ss:$28 sps:$4 sm:$0xff]  }
 0x3ba   :  { %v5826_v58 = vpack.c.bf16 %v2086_v56, %v2086_v56  ;;  %3388 = vmatpush1.bf16.msra.mxu0 %v4544_v51  ;;  %v4622_v51 = vld [vmem:[%s6250_s8 + $0x80] ss:$28 sps:$4 sm:$0xff]   ;;  %v4630_v54 = vld [vmem:[%s6250_s8 + $0x4c] ss:$28 sps:$4 sm:$0xff]  }
 0x3bb   :  { %3389 = vmatprep.subr.bf16.mxu0 %v4552_v55  ;;  %v4625_v55 = vld [vmem:[%s6250_s8 + $0x238] ss:$28 sps:$4 sm:$0xff]   ;;  %v4628_v56 = vld [vmem:[%s6250_s8 + $0x48] ss:$28 sps:$4 sm:$0xff]  }
 0x3bc   :  { %4078 = vmatprep.mubr.msk.bf16.mxu1 %vm1270_vm0, %v5826_v58  ;;  %4079 = vmatprep.mubr.msk.bf16.mxu0 %vm1270_vm0, %v5826_v58  ;;  %v4633_v57 = vld [vmem:[%s6250_s8 + $0x204] ss:$28 sps:$4 sm:$0xff]  }
 0x3bd   :  { %3336 = vmatmul.mubr.bf16.vlgmr.msra.gmra.mxu1 %v5834_v61 }
 0x3be   :  { %3345 = vmatpush1.bf16.msra.mxu1 %v4547_v59  ;;  %3390 = vmatpush1.bf16.msra.mxu0 %v4550_v60  ;;  %v4636_v59 = vld [vmem:[%s6250_s8 + $0x14] ss:$28 sps:$4 sm:$0xff]   ;;  %v4631_v60 = vld [vmem:[%s6250_s8 + $0x200] ss:$28 sps:$4 sm:$0xff]  }
 0x3bf   :  { %3376 = vmatprep.mubr.bf16.mxu1 %v5807_v42  ;;  %3346 = vmatprep.subr.bf16.mxu1 %v4555_v62  ;;  %v4634_v62 = vld [vmem:[%s6250_s8 + $0x10] ss:$28 sps:$4 sm:$0xff]  }
 0x3c0   :  { %3391 = vmatprep.subr.bf16.mxu0 %v4558_v63  ;;  %v4639_v63 = vld [vmem:[%s6250_s8 + $0x1cc] ss:$28 sps:$4 sm:$0xff]  }
 0x3c2   :  { %3347 = vmatpush1.bf16.msra.mxu1 %v4553_v0  ;;  %3392 = vmatpush1.bf16.msra.mxu0 %v4556_v3  ;;  %v4642_v0 = vld [vmem:[%s6250_s8 + $0x35c] ss:$28 sps:$4 sm:$0xff]   ;;  %v4637_v3 = vld [vmem:[%s6250_s8 + $0x1c8] ss:$28 sps:$4 sm:$0xff]  }
 0x3c3   :  { %3348 = vmatprep.subr.bf16.mxu1 %v4561_v4  ;;  %3393 = vmatprep.subr.bf16.mxu0 %v4564_v5  ;;  %v4640_v4 = vld [vmem:[%s6250_s8 + $0x358] ss:$28 sps:$4 sm:$0xff]   ;;  %v4645_v5 = vld [vmem:[%s6250_s8 + $0x324] ss:$28 sps:$4 sm:$0xff]  }
 0x3c6   :  { %3349 = vmatpush1.bf16.msra.mxu1 %v4559_v6  ;;  %3394 = vmatpush1.bf16.msra.mxu0 %v4562_v7  ;;  %v4648_v6 = vld [vmem:[%s6250_s8 + $0x51c] ss:$28 sps:$4 sm:$0xff]  }
 0x3c7   :  { %3350 = vmatprep.subr.bf16.mxu1 %v4567_v10  ;;  %3395 = vmatprep.subr.bf16.mxu0 %v4570_v11  ;;  %v4643_v7 = vld [vmem:[%s6250_s8 + $0x320] ss:$28 sps:$4 sm:$0xff]   ;;  %v4646_v10 = vld [vmem:[%s6250_s8 + $0x518] ss:$28 sps:$4 sm:$0xff]   ;;  %v4651_v11 = vld [vmem:[%s6250_s8 + $0x2ec] ss:$28 sps:$4 sm:$0xff]  }
 0x3ca   :  { %3351 = vmatpush1.bf16.msra.mxu1 %v4565_v12  ;;  %3396 = vmatpush1.bf16.msra.mxu0 %v4568_v13  ;;  %v4654_v12 = vld [vmem:[%s6250_s8 + $0x4e4] ss:$28 sps:$4 sm:$0xff]  }
 0x3cb   :  { %3352 = vmatprep.subr.bf16.mxu1 %v4573_v14  ;;  %3397 = vmatprep.subr.bf16.mxu0 %v4576_v15  ;;  %v4649_v13 = vld [vmem:[%s6250_s8 + $0x2e8] ss:$28 sps:$4 sm:$0xff]   ;;  %v4652_v14 = vld [vmem:[%s6250_s8 + $0x4e0] ss:$28 sps:$4 sm:$0xff]   ;;  %v4657_v15 = vld [vmem:[%s6250_s8 + $0x2b4] ss:$28 sps:$4 sm:$0xff]  }
 0x3ce   :  { %3353 = vmatpush1.bf16.msra.mxu1 %v4571_v17  ;;  %3398 = vmatpush1.bf16.msra.mxu0 %v4574_v18  ;;  %v4660_v17 = vld [vmem:[%s6250_s8 + $0x4ac] ss:$28 sps:$4 sm:$0xff]  }
 0x3cf   :  { %3354 = vmatprep.subr.bf16.mxu1 %v4579_v21  ;;  %3399 = vmatprep.subr.bf16.mxu0 %v4582_v22  ;;  %v4655_v18 = vld [vmem:[%s6250_s8 + $0x2b0] ss:$28 sps:$4 sm:$0xff]   ;;  %v4658_v21 = vld [vmem:[%s6250_s8 + $0x4a8] ss:$28 sps:$4 sm:$0xff]   ;;  %v4663_v22 = vld [vmem:[%s6250_s8 + $0x27c] ss:$28 sps:$4 sm:$0xff]  }
 0x3d2   :  { %3355 = vmatpush1.bf16.msra.mxu1 %v4577_v23  ;;  %3400 = vmatpush1.bf16.msra.mxu0 %v4580_v24  ;;  %v4666_v23 = vld [vmem:[%s6250_s8 + $0x474] ss:$28 sps:$4 sm:$0xff]  }
 0x3d3   :  { %3356 = vmatprep.subr.bf16.mxu1 %v4585_v25  ;;  %3415 = vmatprep.subr.bf16.mxu0 %v4588_v26  ;;  %v4661_v24 = vld [vmem:[%s6250_s8 + $0x278] ss:$28 sps:$4 sm:$0xff]   ;;  %v4664_v25 = vld [vmem:[%s6250_s8 + $0x470] ss:$28 sps:$4 sm:$0xff]   ;;  %v4669_v26 = vld [vmem:[%s6250_s8 + $0x244] ss:$28 sps:$4 sm:$0xff]  }
 0x3d6   :  { %3357 = vmatpush1.bf16.msra.mxu1 %v4583_v27  ;;  %3416 = vmatpush2.bf16.msra.mxu0 %v4586_v28  ;;  %v4672_v27 = vld [vmem:[%s6250_s8 + $0x43c] ss:$28 sps:$4 sm:$0xff]  }
 0x3d7   :  { %3358 = vmatprep.subr.bf16.mxu1 %v4591_v29  ;;  %3426 = vmatprep.subr.bf16.mxu0 %v4594_v30  ;;  %v4667_v28 = vld [vmem:[%s6250_s8 + $0x240] ss:$28 sps:$4 sm:$0xff]   ;;  %v4670_v29 = vld [vmem:[%s6250_s8 + $0x438] ss:$28 sps:$4 sm:$0xff]   ;;  %v4675_v30 = vld [vmem:[%s6250_s8 + $0x20c] ss:$28 sps:$4 sm:$0xff]  }
 0x3d9   :  { %3418 = vmatmul.mubr.bf16.vlgmr.msra.gmra.mxu0 %v5834_v61 }
 0x3da   :  { %3359 = vmatpush1.bf16.msra.mxu1 %v4589_v31  ;;  %3427 = vmatpush1.bf16.msra.mxu0 %v4592_v9  ;;  %v4678_v31 = vld [vmem:[%s6250_s8 + $0x404] ss:$28 sps:$4 sm:$0xff]  }
 0x3db   :  { %3458 = vmatprep.mubr.bf16.mxu0 %v5807_v42  ;;  %3360 = vmatprep.subr.bf16.mxu1 %v4597_v33  ;;  %v4673_v9 = vld [vmem:[%s6250_s8 + $0x208] ss:$28 sps:$4 sm:$0xff]   ;;  %v4676_v33 = vld [vmem:[%s6250_s8 + $0x400] ss:$28 sps:$4 sm:$0xff]  }
 0x3dc   :  { %3428 = vmatprep.subr.bf16.mxu0 %v4600_v34  ;;  %v4681_v34 = vld [vmem:[%s6250_s8 + $0x1d4] ss:$28 sps:$4 sm:$0xff]  }
 0x3de   :  { %3361 = vmatpush2.bf16.msra.mxu1 %v4595_v20  ;;  %3429 = vmatpush1.bf16.msra.mxu0 %v4598_v35  ;;  %v4684_v20 = vld [vmem:[%s6250_s8 + $0x3cc] ss:$28 sps:$4 sm:$0xff]  }
 0x3df   :  { %3362 = vmatprep.subr.bf16.mxu1 %v4603_v8  ;;  %3430 = vmatprep.subr.bf16.mxu0 %v4606_v37  ;;  %v4679_v35 = vld [vmem:[%s6250_s8 + $0x1d0] ss:$28 sps:$4 sm:$0xff]   ;;  %v4682_v8 = vld [vmem:[%s6250_s8 + $0x3c8] ss:$28 sps:$4 sm:$0xff]  }
 0x3e0   :  { %v4687_v37 = vld [vmem:[%s6250_s8 + $0x394] ss:$28 sps:$4 sm:$0xff]  }
 0x3e2   :  { %3363 = vmatpush2.bf16.msra.mxu1 %v4601_v38  ;;  %3431 = vmatpush1.bf16.msra.mxu0 %v4604_v39  ;;  %v4685_v38 = vld [vmem:[%s6250_s8 + $0x390] ss:$28 sps:$4 sm:$0xff]   ;;  %v4688_v39 = vld [vmem:[%s6250_s8 + $0x520] ss:$28 sps:$4 sm:$0xff]  }
 0x3e3   :  { %3364 = vmatprep.subr.bf16.mxu1 %v4609_v36  ;;  %3432 = vmatprep.subr.bf16.mxu0 %v4612_v19  ;;  %v4691_v36 = vld [vmem:[%s6250_s8 + $0x554] ss:$28 sps:$4 sm:$0xff]  }
 0x3e4   :  { %v4689_v19 = vld [vmem:[%s6250_s8 + $0x550] ss:$28 sps:$4 sm:$0xff]  }
 0x3e6   :  { %3365 = vmatpush2.bf16.msra.mxu1 %v4607_v40  ;;  %3433 = vmatpush1.bf16.msra.mxu0 %v4610_v41  ;;  %v4692_v40 = vld [vmem:[%s6250_s8 + $0x4e8] ss:$28 sps:$4 sm:$0xff]   ;;  %v4693_v41 = vld [vmem:[%s6250_s8 + $0x360] ss:$28 sps:$4 sm:$0xff]  }
 0x3e7   :  { %3366 = vmatprep.subr.bf16.mxu1 %v4615_v43  ;;  %3434 = vmatprep.subr.bf16.mxu0 %v4618_v44  ;;  %v4694_v43 = vld [vmem:[%s6250_s8 + $0x1a0] ss:$28 sps:$4 sm:$0xff]   ;;  %v4696_v44 = vld [vmem:[%s6250_s8 + $0x328] ss:$28 sps:$4 sm:$0xff]  }
 0x3ea   :  { %3367 = vmatpush2.bf16.msra.mxu1 %v4613_v46  ;;  %3435 = vmatpush1.bf16.msra.mxu0 %v4616_v47  ;;  %v4697_v46 = vld [vmem:[%s6250_s8 + $0x168] ss:$28 sps:$4 sm:$0xff]   ;;  %v4698_v47 = vld [vmem:[%s6250_s8 + $0x478] ss:$28 sps:$4 sm:$0xff]  }
 0x3eb   :  { %3368 = vmatprep.subr.bf16.mxu1 %v4621_v48  ;;  %3436 = vmatprep.subr.bf16.mxu0 %v4624_v49  ;;  %v4699_v48 = vld [vmem:[%s6250_s8 + $0x2f0] ss:$28 sps:$4 sm:$0xff]   ;;  %v4701_v49 = vld [vmem:[%s6250_s8 + $0x440] ss:$28 sps:$4 sm:$0xff]  }
 0x3ee   :  { %3369 = vmatpush2.bf16.msra.mxu1 %v4619_v50  ;;  %3437 = vmatpush1.bf16.msra.mxu0 %v4622_v51  ;;  %v4702_v50 = vld [vmem:[%s6250_s8 + $0x2b8] ss:$28 sps:$4 sm:$0xff]  }
 0x3ef   :  { %3370 = vmatprep.subr.bf16.mxu1 %v4627_v53  ;;  %3438 = vmatprep.subr.bf16.mxu0 %v4630_v54  ;;  %v4703_v51 = vld [vmem:[%s6250_s8 + $0xf8] ss:$28 sps:$4 sm:$0xff]   ;;  %v4704_v53 = vld [vmem:[%s6250_s8 + $0x408] ss:$28 sps:$4 sm:$0xff]   ;;  %v4705_v54 = vld [vmem:[%s6250_s8 + $0x280] ss:$28 sps:$4 sm:$0xff]  }
 0x3f2   :  { %3371 = vmatpush2.bf16.msra.mxu1 %v4625_v55  ;;  %3439 = vmatpush1.bf16.msra.mxu0 %v4628_v56  ;;  %v4706_v55 = vld [vmem:[%s6250_s8 + $0xc0] ss:$28 sps:$4 sm:$0xff]   ;;  %v4707_v56 = vld [vmem:[%s6250_s8 + $0x3d0] ss:$28 sps:$4 sm:$0xff]  }
 0x3f3   :  { %3372 = vmatprep.subr.bf16.mxu1 %v4633_v57  ;;  %3440 = vmatprep.subr.bf16.mxu0 %v4636_v59  ;;  %v4708_v57 = vld [vmem:[%s6250_s8 + $0x248] ss:$28 sps:$4 sm:$0xff]  }
 0x3f4   :  { %v4709_v59 = vld [vmem:[%s6250_s8 + $0x88] ss:$28 sps:$4 sm:$0xff]  }
 0x3f6   :  { %3373 = vmatpush2.bf16.msra.mxu1 %v4631_v60  ;;  %3441 = vmatpush1.bf16.msra.mxu0 %v4634_v62  ;;  %v4710_v60 = vld [vmem:[%s6250_s8 + $0x398] ss:$28 sps:$4 sm:$0xff]   ;;  %v4711_v62 = vld [vmem:[%s6250_s8 + $0x210] ss:$28 sps:$4 sm:$0xff]  }
 0x3f7   :  { %3374 = vmatprep.subr.bf16.mxu1 %v4639_v63  ;;  %3442 = vmatprep.subr.bf16.mxu0 %v4642_v0  ;;  %v4712_v63 = vld [vmem:[%s6250_s8 + $0x50] ss:$28 sps:$4 sm:$0xff]   ;;  %v4713_v0 = vld [vmem:[%s6250_s8 + $0x558] ss:$28 sps:$4 sm:$0xff]  }
 0x3fa   :  { %3375 = vmatpush2.bf16.msra.mxu1 %v4637_v3  ;;  %3443 = vmatpush2.bf16.msra.mxu0 %v4640_v4  ;;  %v4714_v3 = vld [vmem:[%s6250_s8 + $0x1d8] ss:$28 sps:$4 sm:$0xff]  }
 0x3fb   :  { %3444 = vmatprep.subr.bf16.mxu0 %v4645_v5  ;;  %3467 = vmatprep.subr.bf16.mxu1 %v4648_v6  ;;  %v4715_v4 = vld [vmem:[%s6250_s8 + $0x18] ss:$28 sps:$4 sm:$0xff]   ;;  %v6217_v5 = vld [vmem:[%s6251_s9] sm:$0x7f] }
 0x3fc   :  { %v2292_v6 = vunpack.c.l.bf16 %v6217_v5 }
 0x3fd   :  { %3377 = vmatmul.mubr.bf16.vlgmr.msra.gmra.mxu1 %v5813_v45 }
 0x3fe   :  { %3445 = vmatpush2.bf16.msra.mxu0 %v4643_v7  ;;  %3468 = vmatpush1.bf16.msra.mxu1 %v4646_v10  ;;  %v2303_v10 = vrot.slane %v2292_v6, %v5584_v2 }
 0x3ff   :  { %4080 = vmatprep.mubr.msk.bf16.mxu1 %vm1270_vm0, %v5826_v58  ;;  %3446 = vmatprep.subr.bf16.mxu0 %v4651_v11 }
 0x400   :  { %3469 = vmatprep.subr.bf16.mxu1 %v4654_v12 }
 0x402   :  { %3447 = vmatpush2.bf16.msra.mxu0 %v4649_v13  ;;  %3470 = vmatpush1.bf16.msra.mxu1 %v4652_v14 }
 0x403   :  { %3448 = vmatprep.subr.bf16.mxu0 %v4657_v15  ;;  %3471 = vmatprep.subr.bf16.mxu1 %v4660_v17 }
 0x406   :  { %3449 = vmatpush2.bf16.msra.mxu0 %v4655_v18  ;;  %3472 = vmatpush1.bf16.msra.mxu1 %v4658_v21 }
 0x407   :  { %3450 = vmatprep.subr.bf16.mxu0 %v4663_v22  ;;  %3473 = vmatprep.subr.bf16.mxu1 %v4666_v23 }
 0x40a   :  { %3451 = vmatpush2.bf16.msra.mxu0 %v4661_v24  ;;  %3474 = vmatpush1.bf16.msra.mxu1 %v4664_v25 }
 0x40b   :  { %3452 = vmatprep.subr.bf16.mxu0 %v4669_v26  ;;  %3475 = vmatprep.subr.bf16.mxu1 %v4672_v27 }
 0x40e   :  { %3453 = vmatpush2.bf16.msra.mxu0 %v4667_v28  ;;  %3476 = vmatpush1.bf16.msra.mxu1 %v4670_v29 }
 0x40f   :  { %3454 = vmatprep.subr.bf16.mxu0 %v4675_v30  ;;  %3477 = vmatprep.subr.bf16.mxu1 %v4678_v31 }
 0x412   :  { %3455 = vmatpush2.bf16.msra.mxu0 %v4673_v9  ;;  %3478 = vmatpush1.bf16.msra.mxu1 %v4676_v33 }
 0x413   :  { %3456 = vmatprep.subr.bf16.mxu0 %v4681_v34  ;;  %3479 = vmatprep.subr.bf16.mxu1 %v4684_v20 }
 0x416   :  { %3457 = vmatpush2.bf16.msra.mxu0 %v4679_v35  ;;  %3480 = vmatpush1.bf16.msra.mxu1 %v4682_v8 }
 0x417   :  { %3481 = vmatprep.subr.bf16.mxu1 %v4687_v37  ;;  %3548 = vmatprep.subr.bf16.mxu0 %v4790_v16 }
 0x419   :  { %3459 = vmatmul.mubr.bf16.vlgmr.msra.gmra.mxu0 %v5813_v45 }
 0x41a   :  { %3482 = vmatpush1.bf16.msra.mxu1 %v4685_v38  ;;  %3549 = vmatpush1.bf16.msra.mxu0 %v4688_v39 }
 0x41b   :  { %4081 = vmatprep.mubr.msk.bf16.mxu0 %vm1270_vm0, %v5826_v58  ;;  %3497 = vmatprep.subr.bf16.mxu1 %v4691_v36  ;;  %v4695_v58 = vld [vmem:[%s6250_s8 + $0x4b0] ss:$28 sps:$4 sm:$0xff]  }
 0x41c   :  { %3550 = vmatprep.subr.bf16.mxu0 %v4790_v16 }
 0x41e   :  { %3498 = vmatpush2.bf16.msra.mxu1 %v4689_v19  ;;  %3551 = vmatpush1.bf16.msra.mxu0 %v4692_v40 }
 0x41f   :  { %4111 = vmatprep.subr.bf16.mxu1 %v4693_v41  ;;  %3552 = vmatprep.subr.bf16.mxu0 %v4790_v16 }
 0x421   :  { %3500 = vmatmul.mubr.bf16.vlgmr.msra.gmra.mxu1 %v5834_v61 }
 0x422   :  { %4112 = vmatpush3.bf16.msra.mxu1 %v4694_v43  ;;  %3540 = vmatprep.mubr.bf16.mxu1 %v5807_v42  ;;  %v4700_v42 = vld [vmem:[%s6250_s8 + $0x130] ss:$28 sps:$4 sm:$0xff]   ;;  %s4792_s8 = smov [#allocation4]  }
 0x423   :  { %3553 = vmatpush1.bf16.msra.mxu0 %v4695_v58  ;;  %4113 = vmatprep.subr.bf16.mxu1 %v4696_v44  ;;  %s3655_s9 = sshll.u32 %s4792_s8, 4  ;;  %s3656_s9 = int_to_ptr.vmem [resolvable:$true] %s3655_s9 }
 0x424   :  { %3554 = vmatprep.subr.bf16.mxu0 %v4790_v16  ;;  %s4746_s26 = scalar_lea.vmem %s3656_s9, 128  ;;  %p4751_p1 = scmp.lt.s32.totalorder %s3656_s9, %s3656_s9 }
 0x425   :  { %p4747_p0 = scmp.ne.s32.totalorder %s3656_s9, %s4746_s26  ;;  %p4752_p2 = scmp.lt.s32.totalorder %s4746_s26, %s4746_s26 }
 0x426   :  { %4114 = vmatpush3.bf16.msra.mxu1 %v4697_v46 }
 0x427   :  { %3555 = vmatpush1.bf16.msra.mxu0 %v4698_v47  ;;  %4115 = vmatprep.subr.bf16.mxu1 %v4699_v48  ;;  %p4753_p3 = por %p4752_p2, %p4751_p1 }
 0x428   :  { %3556 = vmatprep.subr.bf16.mxu0 %v4790_v16 }
 0x429   :  { %p4754_p4 = pnand %p4753_p3, %p4747_p0 }
 0x42a   :  { %4116 = vmatpush3.bf16.msra.mxu1 %v4700_v42 }
 0x42b   :  { %3557 = vmatpush1.bf16.msra.mxu0 %v4701_v49  ;;  %4117 = vmatprep.subr.bf16.mxu1 %v4702_v50 }
 0x42c   :  { %3558 = vmatprep.subr.bf16.mxu0 %v4790_v16 }
 0x42e   :  { %4118 = vmatpush3.bf16.msra.mxu1 %v4703_v51 }
 0x42f   :  { %3559 = vmatpush1.bf16.msra.mxu0 %v4704_v53  ;;  %4119 = vmatprep.subr.bf16.mxu1 %v4705_v54 }
 0x430   :  { %3560 = vmatprep.subr.bf16.mxu0 %v4790_v16 }
 0x432   :  { %4120 = vmatpush3.bf16.msra.mxu1 %v4706_v55 }
 0x433   :  { %3561 = vmatpush1.bf16.msra.mxu0 %v4707_v56  ;;  %4121 = vmatprep.subr.bf16.mxu1 %v4708_v57 }
 0x434   :  { %3562 = vmatprep.subr.bf16.mxu0 %v4790_v16 }
 0x436   :  { %4122 = vmatpush3.bf16.msra.mxu1 %v4709_v59 }
 0x437   :  { %3563 = vmatpush1.bf16.msra.mxu0 %v4710_v60  ;;  %4123 = vmatprep.subr.bf16.mxu1 %v4711_v62 }
 0x438   :  { %3578 = vmatprep.subr.bf16.mxu0 %v4790_v16  ;;  %v2299_v16 = vrot.slane %v2292_v6, %v5582_v1 }
 0x43a   :  { %4124 = vmatpush3.bf16.msra.mxu1 %v4712_v63  ;;  %v2334_v12 = vrot.slane %v2299_v16, %v5582_v1 }
 0x43b   :  { %3579 = vmatpush2.bf16.msra.mxu0 %v4713_v0  ;;  %4125 = vmatprep.subr.bf16.mxu1 %v4714_v3 }
 0x43e   :  { %3581 = vmatmul.mubr.bf16.vlgmr.msra.gmra.mxu0 %v5834_v61  ;;  %4126 = vmatpush3.bf16.msra.mxu1 %v4715_v4  ;;  %v2338_v61 = vrot.slane %v2303_v10, %v5582_v1 }
 0x441   :  { %3541 = vmatmul.mubr.bf16.vlgmr.msra.gmra.mxu1 %v5813_v45 }
 0x475   :  { %v3296_v7 = vpop.f32.mrf.mxu0 }
 0x476   :  { %v3297_v45 = vadd.f32 %v3296_v7, %v2334_v12 }
 0x477   :  { %v3298_v11 = vpop.f32.mrf.mxu0 }
 0x478   :  { %v3299_v17 = vadd.f32 %v3298_v11, %v2338_v61 }
 0x479   :  { %v3300_v13 = vpop.f32.mrf.mxu0 }
 0x47b   :  { %v3301_v14 = vpop.f32.mrf.mxu0 }
 0x47d   :  { %v3337_v15 = vpop.f32.mrf.mxu1 }
 0x47e   :  { %v3338_v18 = vadd.f32 %v3337_v15, %v3297_v45 }
 0x47f   :  { %v3339_v21 = vpop.f32.mrf.mxu1 }
 0x480   :  { %v4082_v22 = vmul.f32 -1.442695, %v3338_v18  ;;  %v3340_v23 = vadd.f32 %v3339_v21, %v3299_v17 }
 0x481   :  { %v3341_v24 = vpop.f32.mrf.mxu1 }
 0x482   :  { %4718 = vpow2.f32 %v4082_v22  ;;  %v4083_v25 = vmul.f32 -1.442695, %v3340_v23 }
 0x483   :  { %v3342_v26 = vpop.f32.mrf.mxu1 }
 0x484   :  { %4720 = vpow2.f32 %v4083_v25 }
 0x48f   :  { %v4719_v27 = vpop.eup %4718 }
 0x490   :  { %v3609_v28 = vadd.f32 1.0, %v4719_v27 }
 0x491   :  { %v4721_v29 = vpop.eup %4720 }
 0x492   :  { %4722 = vrcp.f32 %v3609_v28  ;;  %v3610_v30 = vadd.f32 1.0, %v4721_v29 }
 0x494   :  { %4724 = vrcp.f32 %v3610_v30 }
 0x499   :  { %v3419_v31 = vpop.f32.mrf.mxu0 }
 0x49b   :  { %v3421_v9 = vpop.f32.mrf.mxu0 }
 0x49d   :  { %v3423_v33 = vpop.f32.mrf.mxu0 }
 0x49f   :  { %v4723_v34 = vpop.eup %4722  ;;  %v3424_v20 = vpop.f32.mrf.mxu0 }
 0x4a0   :  { %3630 = vst [vmem:[#allocation2] sm:$0xff] %v4723_v34 }
 0x4a1   :  { %v4725_v35 = vpop.eup %4724 }
 0x4a2   :  { %3631 = vst [vmem:[#allocation2 + $0x8] sm:$0xff] %v4725_v35 }
 0x4a3   :  { %4757 = shalt.err (!%p4754_p4)
}
 0x4a4   :  { %3658 = dma.vmem_to_hbm [thread:$0]  %s3656_s9, 128, %s6253_s11, [#allocation5]   ;;  %v2307_v8 = vrot.slane %v2292_v6, %v5590_v32  ;;  %v2311_v37 = vrot.slane %v2292_v6, %v5592_v52  ;;  %v2293_v51 = vunpack.c.h.bf16 %v6217_v5 }
 0x4a5   :  { %s4793_s11 = smov [#allocation2]  }
 0x4a6   :  { %v2342_v38 = vrot.slane %v2307_v8, %v5582_v1  ;;  %v2346_v39 = vrot.slane %v2311_v37, %v5582_v1  ;;  %v2315_v53 = vrot.slane %v2293_v51, %v5582_v1  ;;  %v2319_v55 = vrot.slane %v2293_v51, %v5584_v2  ;;  %s3645_s28 = sshll.u32 %s4793_s11, 4  ;;  %s3646_s28 = int_to_ptr.vmem [resolvable:$true] %s3645_s28 }
 0x4a7   :  { %v2323_v17 = vrot.slane %v2293_v51, %v5590_v32  ;;  %s4766_s6 = scalar_lea.vmem %s3646_s28, 896  ;;  %p4771_p6 = scmp.lt.s32.totalorder %s3646_s28, %s3646_s28 }
 0x4a8   :  { %v2350_v57 = vrot.slane %v2315_v53, %v5582_v1  ;;  %v2354_v60 = vrot.slane %v2319_v55, %v5582_v1  ;;  %p4767_p5 = scmp.ne.s32.totalorder %s3646_s28, %s4766_s6  ;;  %p4772_p7 = scmp.lt.s32.totalorder %s4766_s6, %s4766_s6 }
 0x4a9   :  { %v2358_v23 = vrot.slane %v2323_v17, %v5582_v1 }
 0x4aa   :  { %p4773_p8 = por %p4772_p7, %p4771_p6 }
 0x4ac   :  { %p4774_p9 = pnand %p4773_p8, %p4767_p5 }
 0x4bd   :  { %v3378_v36 = vpop.f32.mrf.mxu1 }
 0x4be   :  { %v3379_v19 = vadd.f32 %v3378_v36, %v2342_v38 }
 0x4bf   :  { %v3380_v40 = vpop.f32.mrf.mxu1 }
 0x4c0   :  { %v3420_v41 = vadd.f32 %v3419_v31, %v3379_v19  ;;  %v3381_v43 = vadd.f32 %v3380_v40, %v2346_v39 }
 0x4c1   :  { %v3382_v58 = vpop.f32.mrf.mxu1 }
 0x4c2   :  { %v4084_v44 = vmul.f32 -1.442695, %v3420_v41  ;;  %v3422_v46 = vadd.f32 %v3421_v9, %v3381_v43 }
 0x4c3   :  { %v3383_v47 = vpop.f32.mrf.mxu1 }
 0x4c4   :  { %4726 = vpow2.f32 %v4084_v44  ;;  %v4085_v48 = vmul.f32 -1.442695, %v3422_v46 }
 0x4c6   :  { %4728 = vpow2.f32 %v4085_v48 }
 0x4d1   :  { %v4727_v42 = vpop.eup %4726 }
 0x4d2   :  { %v3611_v49 = vadd.f32 1.0, %v4727_v42 }
 0x4d3   :  { %v4729_v50 = vpop.eup %4728 }
 0x4d4   :  { %4730 = vrcp.f32 %v3611_v49  ;;  %v3612_v52 = vadd.f32 1.0, %v4729_v50 }
 0x4d6   :  { %4732 = vrcp.f32 %v3612_v52 }
 0x4d9   :  { %v3460_v54 = vpop.f32.mrf.mxu0 }
 0x4da   :  { %v3461_v63 = vadd.f32 %v3460_v54, %v2350_v57 }
 0x4db   :  { %v3462_v56 = vpop.f32.mrf.mxu0 }
 0x4dc   :  { %v3463_v4 = vadd.f32 %v3462_v56, %v2354_v60 }
 0x4dd   :  { %v3464_v59 = vpop.f32.mrf.mxu0 }
 0x4df   :  { %v3465_v62 = vpop.f32.mrf.mxu0 }
 0x4e1   :  { %v4731_v0 = vpop.eup %4730  ;;  %v3501_v3 = vpop.f32.mrf.mxu1 }
 0x4e2   :  { %3632 = vst [vmem:[#allocation2 + $0x10] sm:$0xff] %v4731_v0  ;;  %v3502_v6 = vadd.f32 %v3501_v3, %v3461_v63 }
 0x4e3   :  { %v4733_v5 = vpop.eup %4732  ;;  %v3503_v16 = vpop.f32.mrf.mxu1 }
 0x4e4   :  { %3633 = vst [vmem:[#allocation2 + $0x18] sm:$0xff] %v4733_v5  ;;  %v4086_v7 = vmul.f32 -1.442695, %v3502_v6  ;;  %v3504_v10 = vadd.f32 %v3503_v16, %v3463_v4 }
 0x4e5   :  { %v3505_v11 = vpop.f32.mrf.mxu1 }
 0x4e6   :  { %4734 = vpow2.f32 %v4086_v7  ;;  %v4087_v2 = vmul.f32 -1.442695, %v3504_v10 }
 0x4e7   :  { %v3506_v12 = vpop.f32.mrf.mxu1 }
 0x4e8   :  { %4736 = vpow2.f32 %v4087_v2 }
 0x4f3   :  { %v4735_v13 = vpop.eup %4734 }
 0x4f4   :  { %v3613_v61 = vadd.f32 1.0, %v4735_v13 }
 0x4f5   :  { %v4737_v14 = vpop.eup %4736 }
 0x4f6   :  { %4738 = vrcp.f32 %v3613_v61  ;;  %v3614_v45 = vadd.f32 1.0, %v4737_v14 }
 0x4f8   :  { %4740 = vrcp.f32 %v3614_v45 }
 0x4fe   :  { %v3582_v15 = vpop.f32.mrf.mxu0 }
 0x500   :  { %v3584_v18 = vpop.f32.mrf.mxu0 }
 0x501   :  { %v4127_v21 = vpop.f32.mrf.mxu1 }
 0x502   :  { %v3585_v22 = vpop.f32.mrf.mxu0 }
 0x503   :  { %v4739_v24 = vpop.eup %4738  ;;  %v4128_v25 = vpop.f32.mrf.mxu1 }
 0x504   :  { %3634 = vst [vmem:[#allocation2 + $0x20] sm:$0xff] %v4739_v24  ;;  %v4129_v26 = vadd.f32 %v4128_v25, %v4127_v21  ;;  %v3586_v27 = vpop.f32.mrf.mxu0 }
 0x505   :  { %v4741_v28 = vpop.eup %4740  ;;  %v4130_v29 = vpop.f32.mrf.mxu1 }
 0x506   :  { %3635 = vst [vmem:[#allocation2 + $0x28] sm:$0xff] %v4741_v28  ;;  %v3543_v30 = vadd.f32 %v4129_v26, %v2358_v23 }
 0x507   :  { %v4131_v31 = vpop.f32.mrf.mxu1 }
 0x508   :  { %v3583_v9 = vadd.f32 %v3582_v15, %v3543_v30 }
 0x50a   :  { %v4088_v33 = vmul.f32 -1.442695, %v3583_v9 }
 0x50c   :  { %4742 = vpow2.f32 %v4088_v33 }
 0x519   :  { %v4743_v34 = vpop.eup %4742 }
 0x51a   :  { %v3615_v32 = vadd.f32 1.0, %v4743_v34 }
 0x51c   :  { %4744 = vrcp.f32 %v3615_v32 }
 0x529   :  { %v4745_v1 = vpop.eup %4744 }
 0x52a   :  { %3636 = vst.msk [vmem:[#allocation2 + $0x30] sm:$0xff] %vm1270_vm0, %v4745_v1 }
 0x52b   :  { %4777 = shalt.err (!%p4774_p9)
}
 0x52c   :  { %3648 = dma.vmem_to_hbm [thread:$0]  %s3646_s28, 896, %s6252_s10, [#allocation3]  }
 0x52d   :  { %4786 = dma.done.wait [#allocation3], 896  }
 0x52e   :  { %4787 = vsyncadd [#allocation3], 4294966400 }
 0x52f   :  { %4788 = dma.done.wait [#allocation5], 128  }
 0x530   :  { %4789 = vsyncadd [#allocation5], 4294967168 }
 0x531   :  { %3665 = vsyncpa [#allocation3], 1 }
 0x532   :  { %3666 = vsyncpa [#allocation5], 1 }

</bundles_post_ra>
